<compile_context>
chip_gen: v7x
topology: tpu7x:2x2x1
jax: 0.10.0
libtpu: 0.0.40
codegen_flags: <defaults>
</compile_context>

<pallas_src>
import functools

import jax
import jax.numpy as jnp
from jax import lax
from jax.experimental import pallas as pl
from jax.experimental.pallas import tpu as pltpu


# ----------------------------------------------------------------------------
# Pallas kernel: one grid step == one GLadderModule (one injection layer)
# ----------------------------------------------------------------------------
def gladder_kernel(m_hbm, h0_hbm, w_ref, vec_ref, out_ref, m_vmem, sem, *,
                   eps, weights_resident):
    """One injection layer.

    m_hbm   : [N, N]      bf16  dense MP matrix (raw HBM ref, DMA'd once)
    h0_hbm  : [N, H]      f32   initial hidden states (raw HBM ref, DMA'd once)
    w_ref   : [L, H, 2H]  bf16  resident fused weights [Wm | Wg]  (or
              [H, 2H] per-layer block when not resident)
    vec_ref : [L, 4, H]   f32   resident (bias_msg, bias_gate, gamma, beta)
    out_ref : [N, H]      f32   VMEM-resident cross-layer accumulator
    m_vmem  : [N, N]      bf16  single-buffered VMEM copy of M
    sem     : DMA semaphores (2,)
    """
    l = pl.program_id(0)

    # One-time DMAs at the first layer: M -> VMEM scratch, h0 -> accumulator.
    @pl.when(l == 0)
    def _():
        cp_m = pltpu.make_async_copy(m_hbm, m_vmem, sem.at[0])
        cp_h = pltpu.make_async_copy(h0_hbm, out_ref, sem.at[1])
        cp_m.start()
        cp_h.start()
        cp_m.wait()
        cp_h.wait()

    h = out_ref[...]                                    # [N, H] f32
    h_bf = h.astype(jnp.bfloat16)
    hdim = h.shape[1]

    if weights_resident:
        w = w_ref[l]                                    # (H, 2H) bf16
    else:
        w = w_ref[...]                                  # (H, 2H) bf16
    vec = vec_ref[l]                                    # (4, H)  f32

    bias_m = vec[0:1, :]
    bias_g = vec[1:2, :]
    gamma = vec[2:3, :]
    beta = vec[3:4, :]

    # Fused weight matmul: hw = h @ [Wm | Wg]   (N, 2H), f32 accumulation.
    hw = jnp.dot(h_bf, w, preferred_element_type=jnp.float32)
    h_wm = hw[:, :hdim]                                 # h @ Wm
    gate_pre = hw[:, hdim:]                             # h @ Wg

    # Reassociated message transform: (M @ h) @ Wm == M @ (h @ Wm).
    msg_t = jnp.dot(m_vmem[...], h_wm.astype(jnp.bfloat16),
                    preferred_element_type=jnp.float32) + bias_m
    gate = jax.nn.sigmoid(gate_pre + bias_g)

    # Residual + LayerNorm (all f32 elementwise; bf16 only at MXU operands).
    y = h + gate * msg_t
    mean = jnp.mean(y, axis=-1, keepdims=True)
    var = jnp.mean(jnp.square(y - mean), axis=-1, keepdims=True)
    y_norm = (y - mean) * lax.rsqrt(var + eps)
    out_ref[...] = y_norm * gamma + beta


# ----------------------------------------------------------------------------
# Wrapper
# ----------------------------------------------------------------------------
def _round_up(x, m):
    return (x + m - 1) // m * m


def gladder_lm_forward(hidden_states, mp_matrix, params, *, scaling, eps=1e-5,
                       min_rows=256):
    N, H = hidden_states.shape
    L = params["wm"].shape[0]
    # Pad node dim so MXU rows are filled (zero rows/cols of M are inert).
    N_pad = max(min_rows, _round_up(N, 128))
    # TODO(synk): H is assumed to be a multiple of 128 (lane-dense stores).

    # Fold LoRA into the base weights once (inference; dropout == identity).
    wm_eff = params["wm"] + scaling * jnp.einsum(
        "lhr,lro->lho", params["am"], params["bmB"])
    wg_eff = params["wg"] + scaling * jnp.einsum(
        "lhr,lro->lho", params["ag"], params["bgB"])

    # Fused weight layout [L, H, 2H] (bf16); small vectors [L, 4, H] (f32).
    w_packed = jnp.concatenate([wm_eff, wg_eff], axis=-1).astype(jnp.bfloat16)
    vec_packed = jnp.concatenate(
        [params["bm"], params["bg"], params["gamma"], params["beta"]],
        axis=1).astype(jnp.float32)

    # Zero-padded MP matrix and initial hidden states.
    m_bf16 = jnp.zeros((N_pad, N_pad), jnp.bfloat16)
    m_bf16 = m_bf16.at[:N, :N].set(mp_matrix.astype(jnp.bfloat16))
    h0_f32 = jnp.zeros((N_pad, H), jnp.float32)
    h0_f32 = h0_f32.at[:N, :].set(hidden_states.astype(jnp.float32))

    # Keep the whole weight stack VMEM-resident when small; stream otherwise.
    w_bytes = int(w_packed.size) * 2
    weights_resident = w_bytes <= (8 << 20)
    if weights_resident:
        w_spec = pl.BlockSpec((L, H, 2 * H), lambda l: (0, 0, 0))
    else:
        w_spec = pl.BlockSpec((pl.Squeezed(), H, 2 * H), lambda l: (l, 0, 0))
    vec_spec = pl.BlockSpec((L, 4, H), lambda l: (0, 0, 0))

    grid_spec = pltpu.PrefetchScalarGridSpec(
        num_scalar_prefetch=0,
        grid=(L,),
        in_specs=[
            pl.BlockSpec(memory_space=pl.ANY),   # M   (raw HBM, manual DMA)
            pl.BlockSpec(memory_space=pl.ANY),   # h0  (raw HBM, manual DMA)
            w_spec,
            vec_spec,
        ],
        # Constant block index across the layer axis -> VMEM-resident f32
        # accumulator; written back to HBM only once at the end of the grid.
        out_specs=pl.BlockSpec((N_pad, H), lambda l: (0, 0)),
        scratch_shapes=[
            pltpu.VMEM((N_pad, N_pad), jnp.bfloat16),   # single-buffered M
            pltpu.SemaphoreType.DMA((2,)),
        ],
    )

    # Generation-aware VMEM cap with headroom.
    vmem_needed = (N_pad * N_pad * 2            # M scratch
                   + 2 * N_pad * H * 4          # output buffers
                   + 2 * int(w_packed.size) * 2
                   + 2 * int(vec_packed.size) * 4)
    try:
        vmem_cap = int(pltpu.get_tpu_info().vmem_capacity_bytes)
    except Exception:
        vmem_cap = 64 * 1024 * 1024
    vmem_limit = int(min(0.85 * vmem_cap,
                         max(2 * vmem_needed + (4 << 20), 32 << 20)))

    cost = pl.CostEstimate(
        flops=L * (4 * N_pad * H * H + 2 * N_pad * N_pad * H),
        transcendentals=L * (N_pad * H + N_pad),
        bytes_accessed=(N_pad * N_pad * 2 + 2 * N_pad * H * 4
                        + L * (H * 2 * H * 2 + 4 * H * 4)),
    )

    kernel = functools.partial(gladder_kernel, eps=eps,
                               weights_resident=weights_resident)

    out_padded = pl.pallas_call(
        kernel,
        out_shape=jax.ShapeDtypeStruct((N_pad, H), jnp.float32),
        grid_spec=grid_spec,
        compiler_params=pltpu.CompilerParams(
            dimension_semantics=("arbitrary",),   # layers are sequential
            vmem_limit_bytes=vmem_limit),
        cost_estimate=cost,
    )(m_bf16, h0_f32, w_packed, vec_packed)

    return out_padded[:N]


# ----------------------------------------------------------------------------
# Glue: densify GCN message passing (add_self_loops + sym-norm + mean aggr)
# ----------------------------------------------------------------------------
def build_mp_matrix(edge_index, num_nodes, dtype=jnp.float32):
    loops = jnp.arange(num_nodes, dtype=edge_index.dtype)
    src = jnp.concatenate([edge_index[0], loops])     # row (message sources)
    dst = jnp.concatenate([edge_index[1], loops])     # col (aggregation targets)
    deg = jnp.zeros((num_nodes,), dtype).at[dst].add(1.0)     # degree(col)
    dinv = jnp.where(deg > 0, lax.rsqrt(deg), 0.0)
    norm = dinv[src] * dinv[dst]
    A = jnp.zeros((num_nodes, num_nodes), dtype).at[dst, src].add(norm)
    # 'mean' aggregation over incoming edges at each target node
    return A / jnp.maximum(deg, 1.0)[:, None]


def init_params(key, num_layers_inj, hidden, rank):
    keys = jax.random.split(key, 8)
    sd = 0.05
    shp = lambda *s: (num_layers_inj,) + s
    # Weights stored pre-transposed as [in, out] so the kernel does x @ W.
    # NOTE: the PyTorch module zero-inits lora_B; here we use small random
    # values so the (folded) LoRA branch is numerically exercised.
    return {
        "wm":  sd * jax.random.normal(keys[0], shp(hidden, hidden), jnp.float32),
        "bm":  sd * jax.random.normal(keys[1], shp(1, hidden), jnp.float32),
        "am":  sd * jax.random.normal(keys[2], shp(hidden, rank), jnp.float32),
        "bmB": sd * jax.random.normal(keys[3], shp(rank, hidden), jnp.float32),
        "wg":  sd * jax.random.normal(keys[4], shp(hidden, hidden), jnp.float32),
        "bg":  sd * jax.random.normal(keys[5], shp(1, hidden), jnp.float32),
        "ag":  sd * jax.random.normal(keys[6], shp(hidden, rank), jnp.float32),
        "bgB": sd * jax.random.normal(keys[7], shp(rank, hidden), jnp.float32),
        "gamma": jnp.ones(shp(1, hidden), jnp.float32),
        "beta":  jnp.zeros(shp(1, hidden), jnp.float32),
    }


def reference_forward(h, M, params, scaling, eps=1e-5):
    """Pure-JAX reference using the same folded/fused weights, the same
    reassociated matmul order, and the same bf16 cast points as the kernel."""
    L = params["wm"].shape[0]
    H = h.shape[1]
    wm_eff = params["wm"] + scaling * jnp.einsum(
        "lhr,lro->lho", params["am"], params["bmB"])
    wg_eff = params["wg"] + scaling * jnp.einsum(
        "lhr,lro->lho", params["ag"], params["bgB"])
    w_cat = jnp.concatenate([wm_eff, wg_eff], axis=-1).astype(jnp.bfloat16)
    M_bf = M.astype(jnp.bfloat16)
    for l in range(L):
        hb = h.astype(jnp.bfloat16)
        hw = jnp.dot(hb, w_cat[l], preferred_element_type=jnp.float32)
        h_wm = hw[:, :H]
        gate_pre = hw[:, H:]
        msg_t = jnp.dot(M_bf, h_wm.astype(jnp.bfloat16),
                        preferred_element_type=jnp.float32) + params["bm"][l]
        gate = jax.nn.sigmoid(gate_pre + params["bg"][l])
        y = h + gate * msg_t
        mean = y.mean(-1, keepdims=True)
        var = ((y - mean) ** 2).mean(-1, keepdims=True)
        h = (y - mean) / jnp.sqrt(var + eps) * params["gamma"][l] + params["beta"][l]
    return h


if __name__ == "__main__":
    # GLadderLM(hidden_size=128, num_layers=4) -> injection_layers = [0, 2]
    num_nodes, hidden, rank = 8, 128, 16
    num_layers, lora_alpha = 4, 32.0
    injection_layers = list(range(0, num_layers, 2))
    L = len(injection_layers)
    scaling = lora_alpha / rank

    key = jax.random.PRNGKey(0)
    k_h, k_e, k_p = jax.random.split(key, 3)

    hidden_states = jax.random.normal(k_h, (num_nodes, hidden), jnp.float32)
    edge_index = jax.random.randint(k_e, (2, 16), 0, num_nodes, jnp.int32)

    params = init_params(k_p, L, hidden, rank)
    M = build_mp_matrix(edge_index, num_nodes)

    out = gladder_lm_forward(hidden_states, M, params, scaling=scaling)
    out = jax.block_until_ready(out)

    ref = reference_forward(hidden_states, M, params, scaling)
    assert out.shape == (num_nodes, hidden)
    assert jnp.allclose(out, ref, atol=5e-3, rtol=5e-3), "mismatch vs JAX reference"

    print("KERNEL_OK")
</pallas_src>

<mosaic_0001>
module attributes {stable_mosaic.version = 11 : i64} {
  func.func @gladder_kernel(%arg0: i32, %arg1: memref<256x256xbf16, #tpu.memory_space<any>>, %arg2: memref<256x128xf32, #tpu.memory_space<any>>, %arg3: memref<2x128x256xbf16, #tpu.memory_space<vmem>>, %arg4: memref<2x4x128xf32, #tpu.memory_space<vmem>>, %arg5: memref<256x128xf32, #tpu.memory_space<vmem>>, %arg6: memref<256x256xbf16, #tpu.memory_space<vmem>>, %arg7: memref<2x!tpu.dma_semaphore, #tpu.memory_space<semaphore_mem>>) attributes {dimension_semantics = [#tpu.dimension_semantics<arbitrary>], iteration_bounds = array<i64: 2>, scalar_prefetch = 0 : i64, scratch_operands = 2 : i64, tpu.core_type = #tpu.core_type<tc>, window_params = [{}, {}, {pipeline_mode = #tpu.pipeline_mode<synchronous>, transform_indices = @transform_2, window_bounds = array<i64: 2, 128, 256>}, {pipeline_mode = #tpu.pipeline_mode<synchronous>, transform_indices = @transform_3, window_bounds = array<i64: 2, 4, 128>}, {pipeline_mode = #tpu.pipeline_mode<synchronous>, transform_indices = @transform_4, window_bounds = array<i64: 256, 128>}]} {
    %c0_i32 = arith.constant 0 : i32
    %0 = arith.cmpi eq, %arg0, %c0_i32 : i32
    %1 = arith.extui %0 : i1 to i32
    %c0_i32_0 = arith.constant 0 : i32
    %2 = arith.cmpi ne, %1, %c0_i32_0 : i32
    scf.if %2 {
      %c0_i32_17 = arith.constant 0 : i32
      %55 = tpu.memref_slice %arg7[%c0_i32_17] : memref<2x!tpu.dma_semaphore, #tpu.memory_space<semaphore_mem>> -> memref<1x!tpu.dma_semaphore, #tpu.memory_space<semaphore_mem>>
      %56 = tpu.memref_squeeze %55 : memref<1x!tpu.dma_semaphore, #tpu.memory_space<semaphore_mem>> -> memref<!tpu.dma_semaphore, #tpu.memory_space<semaphore_mem>>
      tpu.enqueue_dma source(%arg1 : memref<256x256xbf16, #tpu.memory_space<any>>) target(%arg6 : memref<256x256xbf16, #tpu.memory_space<vmem>>) target_semaphore(%56 : memref<!tpu.dma_semaphore, #tpu.memory_space<semaphore_mem>>)
      %c1_i32 = arith.constant 1 : i32
      %57 = tpu.memref_slice %arg7[%c1_i32] : memref<2x!tpu.dma_semaphore, #tpu.memory_space<semaphore_mem>> -> memref<1x!tpu.dma_semaphore, #tpu.memory_space<semaphore_mem>>
      %58 = tpu.memref_squeeze %57 : memref<1x!tpu.dma_semaphore, #tpu.memory_space<semaphore_mem>> -> memref<!tpu.dma_semaphore, #tpu.memory_space<semaphore_mem>>
      tpu.enqueue_dma source(%arg2 : memref<256x128xf32, #tpu.memory_space<any>>) target(%arg5 : memref<256x128xf32, #tpu.memory_space<vmem>>) target_semaphore(%58 : memref<!tpu.dma_semaphore, #tpu.memory_space<semaphore_mem>>)
      %c0_i32_18 = arith.constant 0 : i32
      %59 = tpu.memref_slice %arg7[%c0_i32_18] : memref<2x!tpu.dma_semaphore, #tpu.memory_space<semaphore_mem>> -> memref<1x!tpu.dma_semaphore, #tpu.memory_space<semaphore_mem>>
      %60 = tpu.memref_squeeze %59 : memref<1x!tpu.dma_semaphore, #tpu.memory_space<semaphore_mem>> -> memref<!tpu.dma_semaphore, #tpu.memory_space<semaphore_mem>>
      tpu.wait_dma2 semaphore(%60 : memref<!tpu.dma_semaphore, #tpu.memory_space<semaphore_mem>>) src(%arg1 : memref<256x256xbf16, #tpu.memory_space<any>>) dst(%arg6 : memref<256x256xbf16, #tpu.memory_space<vmem>>)
      %c1_i32_19 = arith.constant 1 : i32
      %61 = tpu.memref_slice %arg7[%c1_i32_19] : memref<2x!tpu.dma_semaphore, #tpu.memory_space<semaphore_mem>> -> memref<1x!tpu.dma_semaphore, #tpu.memory_space<semaphore_mem>>
      %62 = tpu.memref_squeeze %61 : memref<1x!tpu.dma_semaphore, #tpu.memory_space<semaphore_mem>> -> memref<!tpu.dma_semaphore, #tpu.memory_space<semaphore_mem>>
      tpu.wait_dma2 semaphore(%62 : memref<!tpu.dma_semaphore, #tpu.memory_space<semaphore_mem>>) src(%arg2 : memref<256x128xf32, #tpu.memory_space<any>>) dst(%arg5 : memref<256x128xf32, #tpu.memory_space<vmem>>)
    } else {
    }
    %c0 = arith.constant 0 : index
    %c0_1 = arith.constant 0 : index
    %3 = vector.load %arg5[%c0, %c0_1] : memref<256x128xf32, #tpu.memory_space<vmem>>, vector<256x128xf32>
    %4 = arith.truncf %3 : vector<256x128xf32> to vector<256x128xbf16>
    %5 = arith.index_cast %arg0 : i32 to index
    %c0_2 = arith.constant 0 : index
    %c0_3 = arith.constant 0 : index
    %6 = vector.load %arg3[%5, %c0_2, %c0_3] : memref<2x128x256xbf16, #tpu.memory_space<vmem>>, vector<1x128x256xbf16>
    %7 = vector.shape_cast %6 : vector<1x128x256xbf16> to vector<128x256xbf16>
    %8 = arith.index_cast %arg0 : i32 to index
    %c0_4 = arith.constant 0 : index
    %c0_5 = arith.constant 0 : index
    %9 = vector.load %arg4[%8, %c0_4, %c0_5] : memref<2x4x128xf32, #tpu.memory_space<vmem>>, vector<1x4x128xf32>
    %10 = vector.shape_cast %9 : vector<1x4x128xf32> to vector<4x128xf32>
    %11 = vector.extract_strided_slice %10 {offsets = [0, 0], sizes = [1, 128], strides = [1, 1]} : vector<4x128xf32> to vector<1x128xf32>
    %12 = vector.extract_strided_slice %10 {offsets = [1, 0], sizes = [1, 128], strides = [1, 1]} : vector<4x128xf32> to vector<1x128xf32>
    %13 = vector.extract_strided_slice %10 {offsets = [2, 0], sizes = [1, 128], strides = [1, 1]} : vector<4x128xf32> to vector<1x128xf32>
    %14 = vector.extract_strided_slice %10 {offsets = [3, 0], sizes = [1, 128], strides = [1, 1]} : vector<4x128xf32> to vector<1x128xf32>
    %cst = arith.constant dense<0.000000e+00> : vector<256x256xf32>
    %15 = tpu.matmul %4, %7, %cst {dimension_numbers = #tpu.dot_dimension_numbers<[1], [0], [0], [1], [0, 0, 1, 1], [], []>} : vector<256x128xbf16>, vector<128x256xbf16>, vector<256x256xf32> -> vector<256x256xf32>
    %16 = vector.extract_strided_slice %15 {offsets = [0, 0], sizes = [256, 128], strides = [1, 1]} : vector<256x256xf32> to vector<256x128xf32>
    %17 = vector.extract_strided_slice %15 {offsets = [0, 128], sizes = [256, 128], strides = [1, 1]} : vector<256x256xf32> to vector<256x128xf32>
    %c0_6 = arith.constant 0 : index
    %c0_7 = arith.constant 0 : index
    %18 = vector.load %arg6[%c0_6, %c0_7] : memref<256x256xbf16, #tpu.memory_space<vmem>>, vector<256x256xbf16>
    %19 = arith.truncf %16 : vector<256x128xf32> to vector<256x128xbf16>
    %cst_8 = arith.constant dense<0.000000e+00> : vector<256x128xf32>
    %20 = tpu.matmul %18, %19, %cst_8 {dimension_numbers = #tpu.dot_dimension_numbers<[1], [0], [0], [1], [0, 0, 1, 1], [], []>} : vector<256x256xbf16>, vector<256x128xbf16>, vector<256x128xf32> -> vector<256x128xf32>
    %21 = vector.broadcast %11 : vector<1x128xf32> to vector<256x128xf32>
    %22 = arith.addf %20, %21 : vector<256x128xf32>
    %23 = vector.broadcast %12 : vector<1x128xf32> to vector<256x128xf32>
    %24 = arith.addf %17, %23 : vector<256x128xf32>
    %25 = arith.negf %24 : vector<256x128xf32>
    %26 = math.exp %25 : vector<256x128xf32>
    %cst_9 = arith.constant 1.000000e+00 : f32
    %27 = vector.broadcast %cst_9 : f32 to vector<256x128xf32>
    %28 = arith.addf %27, %26 : vector<256x128xf32>
    %29 = arith.divf %27, %28 : vector<256x128xf32>
    %30 = arith.mulf %29, %22 : vector<256x128xf32>
    %31 = arith.addf %3, %30 : vector<256x128xf32>
    %cst_10 = arith.constant dense<0.000000e+00> : vector<256xf32>
    %32 = vector.multi_reduction <add>, %31, %cst_10 [1] : vector<256x128xf32> to vector<256xf32>
    %33 = vector.shape_cast %32 : vector<256xf32> to vector<256x1xf32>
    %cst_11 = arith.constant 1.280000e+02 : f32
    %34 = vector.broadcast %cst_11 : f32 to vector<256x1xf32>
    %35 = arith.divf %33, %34 : vector<256x1xf32>
    %36 = vector.broadcast %35 : vector<256x1xf32> to vector<256x128xf32>
    %37 = arith.subf %31, %36 : vector<256x128xf32>
    %38 = arith.mulf %37, %37 : vector<256x128xf32>
    %cst_12 = arith.constant dense<0.000000e+00> : vector<256xf32>
    %39 = vector.multi_reduction <add>, %38, %cst_12 [1] : vector<256x128xf32> to vector<256xf32>
    %40 = vector.shape_cast %39 : vector<256xf32> to vector<256x1xf32>
    %cst_13 = arith.constant 1.280000e+02 : f32
    %41 = vector.broadcast %cst_13 : f32 to vector<256x1xf32>
    %42 = arith.divf %40, %41 : vector<256x1xf32>
    %43 = vector.broadcast %35 : vector<256x1xf32> to vector<256x128xf32>
    %44 = arith.subf %31, %43 : vector<256x128xf32>
    %cst_14 = arith.constant 9.99999974E-6 : f32
    %45 = vector.broadcast %cst_14 : f32 to vector<256x1xf32>
    %46 = arith.addf %42, %45 : vector<256x1xf32>
    %47 = math.rsqrt %46 : vector<256x1xf32>
    %48 = vector.broadcast %47 : vector<256x1xf32> to vector<256x128xf32>
    %49 = arith.mulf %44, %48 : vector<256x128xf32>
    %50 = vector.broadcast %13 : vector<1x128xf32> to vector<256x128xf32>
    %51 = arith.mulf %49, %50 : vector<256x128xf32>
    %52 = vector.broadcast %14 : vector<1x128xf32> to vector<256x128xf32>
    %53 = arith.addf %51, %52 : vector<256x128xf32>
    %c0_15 = arith.constant 0 : index
    %c0_16 = arith.constant 0 : index
    %54 = vector.load %arg5[%c0_15, %c0_16] : memref<256x128xf32, #tpu.memory_space<vmem>>, vector<256x128xf32>
    tpu.vector_store %arg5[%c0_15, %c0_16], %53 {strides = array<i32>} : memref<256x128xf32, #tpu.memory_space<vmem>>, vector<256x128xf32>,
    return
  }
  func.func @transform_2(%arg0: i32) -> (i32, i32, i32) {
    %c0_i32 = arith.constant 0 : i32
    %c0_i32_0 = arith.constant 0 : i32
    %c0_i32_1 = arith.constant 0 : i32
    %c0_i32_2 = arith.constant 0 : i32
    return %c0_i32, %c0_i32_0, %c0_i32_1 : i32, i32, i32
  }
  func.func @transform_3(%arg0: i32) -> (i32, i32, i32) {
    %c0_i32 = arith.constant 0 : i32
    %c0_i32_0 = arith.constant 0 : i32
    %c0_i32_1 = arith.constant 0 : i32
    %c0_i32_2 = arith.constant 0 : i32
    return %c0_i32, %c0_i32_0, %c0_i32_1 : i32, i32, i32
  }
  func.func @transform_4(%arg0: i32) -> (i32, i32) {
    %c0_i32 = arith.constant 0 : i32
    %c0_i32_0 = arith.constant 0 : i32
    %c0_i32_1 = arith.constant 0 : i32
    return %c0_i32, %c0_i32_0 : i32, i32
  }
}

</mosaic_0001>

<bundles_post_ra>
// kernel: tpu_custom_call.1
= control target key start
LH: loop header
LB: loop body
LE: loop exit
PB: predicated region body
PF: predicated region fallthrough
CT: control target
= control target key end

     0   :  { %9 = vsyncpa [#allocation5], 0  ;;  %s2939_s0 = inlined_call_operand.hbm [shape: bf16[256,256], index: 0, kind: input, shape index: {}]   ;;  %s2940_s1 = inlined_call_operand.hbm [shape: f32[256,128], index: 1, kind: input, shape index: {}]   ;;  %s2941_s2 = inlined_call_operand.hbm [shape: bf16[2,128,256], index: 2, kind: input, shape index: {}]   ;;  %s2942_s3 = inlined_call_operand.vmem [shape: f32[2,4,128], index: 3, kind: input, shape index: {}]   ;;  %s2943_s4 = inlined_call_operand.hbm [shape: f32[256,128], index: 4, kind: output, shape index: {}]  }
   0x1   :  { %10 = vsyncpa [#allocation6], 0  ;;  %s2163_s15 = smov 0  }
   0x2 LB: > { %s2169_s16 = sadd.s32 4294967295, %s2121_s15   ;;  %p1557_p0 = scmp.ge.s32.totalorder %s2121_s15, 1  ;;  %s2121_s15 = sphi %s2163_s15, %s16_s15  }
   0x3   : > { %p84_p1 = scmp.lt.s32.totalorder %s2121_s15, 3  ;;  %s2123_s17 = smov [#allocation4]  }
   0x4   : > { %s96_s18 = sshll.u32 %s2123_s17, 4  ;;  %p2944_p3 = scmp.eq.s32.totalorder %s2169_s16, 0  ;;  %s97_s18 = int_to_ptr.vmem [resolvable:$true] %s96_s18 }
   0x5   : > { %p2173_p2 = pnand %p1557_p0, %p84_p1  ;;  %s2019_s23 = scalar_lea.hbm %s2941_s2, 4096 }
   0x6   : > { %p2020_p6 = scmp.ne.s32.totalorder %s2941_s2, %s2019_s23  ;;  %p2026_p10 = scmp.lt.u32.totalorder %s2019_s23, %s2941_s2 }
   0x7   : > { %s2948_s19 = scalar_select %p2173_p2, 1, 0 }
   0x8   : > { %p1757_p4 = pneg %p2173_p2 }
   0xa   : > { %p2182_p5 = pnand %p2944_p3, %p1757_p4 }
   0xc   : > { %p2021_p7 = pneg %p2182_p5 }
   0xe   : > { %p2022_p8 = pnand %p2021_p7, %p2020_p6 }
  0x10   : > { %p2023_p9 = pneg %p2022_p8 }
  0x12   : > { %p2028_p11 = pnand %p2026_p10, %p2023_p9 }
  0x14   : > { %2031 = shalt.err (!%p2028_p11)
}
  0x15   : > { %s2032_s28 = scalar_lea.vmem %s97_s18, 4096  ;;  %p2040_p1 = scmp.lt.s32.totalorder %s97_s18, %s97_s18 }
  0x16   : > { %p2033_p12 = scmp.ne.s32.totalorder %s97_s18, %s2032_s28  ;;  %p2041_p4 = scmp.lt.s32.totalorder %s2032_s28, %s2032_s28 }
  0x18   : > { %p2035_p13 = pnand %p2033_p12, %p2021_p7  ;;  %p2042_p3 = por %p2041_p4, %p2040_p1 }
  0x1a   : > { %p2036_p0 = pneg %p2035_p13 }
  0x1c   : > { %p2043_p2 = pnand %p2042_p3, %p2036_p0 }
  0x1e   : > { %2046 = shalt.err (!%p2043_p2)
}
  0x1f   : > { %s2124_s29 = smov 128   ;;  %s2125_s30 = smov 8  }
  0x20   : > { %1760 = dma.hbm_to_vmem [thread:$0]  (!%p2182_p5), %s2941_s2, 4096, %s97_s18, [#allocation5], %s2124_s29, %s2124_s29, %s2125_s30  }
  0x21   : > { %p2950_p6 = scmp.ne.s32.totalorder %s2948_s19, 0 }
  0x23   : > { %115 = sbr.rel (%p2950_p6) target bundleno = 1140 (0x474), region = 28 }
  0x2a   : > { %p2951_p8 = scmp.eq.s32.totalorder %s2169_s16, 0 }
  0x2c   : > { %2104 = dma.done.wait (%p2951_p8), [#allocation5], 4096   ;;  %p2952_p7 = pmov %p2951_p8 }
  0x2e   : > { %2106 = vsyncadd (%p2952_p7), [#allocation5], 4294963200 }
  0x2f   : > { %p2953_p3 = pmov %p2952_p7  ;;  %s2126_s9 = smov [#allocation2]  }
  0x30   : > { %s144_s10 = sshll.u32 %s2126_s9, 4  ;;  %s2127_s11 = smov 256   ;;  %s145_s10 = int_to_ptr.vmem [resolvable:$true] %s144_s10 }
  0x31   : > { %s1739_s7 = scalar_select %p2953_p3, [#allocation0], [#allocation14] }
  0x32   : > { %p2954_p2 = pmov %p2953_p3  ;;  %s2128_s12 = smov 2  }
  0x33   : > { %s136_s8 = sld [smem:[%s1739_s7]]   ;;  %s2129_s13 = smov 64  }
  0x34   : > { %1740 = sst [smem:[#allocation9]] (%p2954_p2), %s2127_s11  ;;  %p2955_p5 = pmov %p2954_p2 }
  0x35   : > { %p2956_p9 = pmov %p2954_p2  ;;  %p2957_p10 = pmov %p2954_p2 }
  0x36   : > { %1741 = sst [smem:[#allocation9 + $0x1]] (%p2955_p5), %s2127_s11  ;;  %s2130_s14 = smov 128  }
  0x37   : > { %1742 = sst [smem:[#allocation9 + $0x2]] (%p2956_p9), %s2128_s12  ;;  %p2958_p11 = pmov %p2954_p2 }
  0x38   : > { %1743 = sst [smem:[#allocation9 + $0x3]] (%p2957_p10), %s2129_s13  ;;  %p2959_p12 = pmov %p2954_p2 }
  0x39   : > { %1744 = sst [smem:[#allocation9 + $0x4]] (%p2958_p11), %s2130_s14  ;;  %s1562_s17 = sshll.u32 %s136_s8, 26 }
  0x3a   : > { %1745 = sst [smem:[#allocation9 + $0x5]] (%p2959_p12), %s2128_s12  ;;  %s1563_s18 = sadd.s32 134217728, %s1562_s17 }
  0x3b   : > { %p2960_p13 = pmov %p2954_p2  ;;  %p2961_p0 = pmov %p2954_p2 }
  0x3c   : > { %s2131_s19 = smov 4   ;;  %s2132_s20 = smov [#allocation3]  }
  0x3d   : > { %1746 = sst [smem:[#allocation9 + $0x6]] (%p2960_p13), %s2130_s14  ;;  %p2962_p1 = pmov %p2961_p0 }
  0x3e   : > { %1747 = sst [smem:[#allocation9 + $0x7]] (%p2961_p0), %s2129_s13  ;;  %s2133_s21 = smov [#allocation8]  }
  0x3f   : > { %1748 = sst [smem:[#allocation9 + $0x8]] (%p2962_p1), %s2131_s19  ;;  %p2963_p4 = pmov %p2961_p0 }
  0x40   : > { %s2134_s24 = smov [#allocation7]   ;;  %s2047_s28 = scalar_lea.hbm %s2940_s1, 4096 }
  0x41   : > { %1749 = dma.general (%p2963_p4), %s2939_s0, 4096, %s145_s10, %s2132_s20, %s2133_s21, [#allocation9], %s1563_s18, 0  }
  0x42   : > { %s175_s25 = sshll.u32 %s2134_s24, 4  ;;  %p2048_p6 = scmp.ne.s32.totalorder %s2940_s1, %s2047_s28  ;;  %s2233_s25 = int_to_ptr.vmem [resolvable:$true] %s175_s25 }
  0x43   : > { %p2964_p8 = pmov %p2961_p0  ;;  %p2053_p2 = scmp.lt.u32.totalorder %s2047_s28, %s2940_s1 }
  0x45   : > { %p2049_p7 = pnand %p2048_p6, %p2964_p8 }
  0x47   : > { %p2050_p3 = pneg %p2049_p7 }
  0x49   : > { %p2055_p5 = pnand %p2053_p2, %p2050_p3 }
  0x4b   : > { %2058 = shalt.err (!%p2055_p5)  }
  0x4c   : > { %s2247_s7 = scalar_lea.vmem %s2233_s25, 4096  ;;  %p2965_p10 = pmov %p2961_p0 }
  0x4d   : > { %p2060_p9 = scmp.ne.s32.totalorder %s2233_s25, %s2247_s7  ;;  %p2066_p13 = scmp.lt.s32.totalorder %s2233_s25, %s2233_s25 }
  0x4e   : > { %p2067_p0 = scmp.lt.s32.totalorder %s2247_s7, %s2247_s7 }
  0x4f   : > { %p2061_p11 = pnand %p2060_p9, %p2965_p10 }
  0x50   : > { %p2260_p1 = por %p2067_p0, %p2066_p13 }
  0x51   : > { %p2062_p12 = pneg %p2061_p11 }
  0x53   : > { %p2069_p4 = pnand %p2260_p1, %p2062_p12 }
  0x55   : > { %2072 = shalt.err (!%p2069_p4)  }
  0x56   : > { %p2967_p6 = pmov %p2964_p8 }
  0x58   : > { %1750 = dma.hbm_to_vmem [thread:$0]  (%p2967_p6), %s2940_s1, 4096, %s2233_s25, [#allocation3 + $0x1] }
  0x59   : > { %p2968_p8 = pmov %p2967_p6 }
  0x5a   : > { %p2969_p7 = pmov %p2967_p6 }
  0x5b   : > { %2108 = dma.done.wait (%p2968_p8), [#allocation3], 4096 }
  0x5c   : > { %2110 = vsyncadd (%p2969_p7), [#allocation3], 4294963200  ;;  %p2970_p3 = pmov %p2967_p6 }
  0x5e   : > { %2112 = dma.done.wait (%p2970_p3), [#allocation3 + $0x1], 4096  ;;  %p2971_p2 = pmov %p2970_p3 }
  0x5f   : > { %s1621_s11 = sshll.u32 %s2169_s16, 7  ;;  %v2135_v0 = vmov 0   ;;  %v2282_v17 = vld [vmem:[#allocation7] sm:$0xff]  ;;  %v2284_v18 = vld [vmem:[#allocation7 + $0x8] sm:$0xff]  ;;  %v2289_v20 = vld [vmem:[#allocation7 + $0x10] sm:$0xff]  ;;  %s1566_s13 = sshll.u32 %s2169_s16, 2 }
  0x60   : > { %2114 = vsyncadd (%p2971_p2), [#allocation3 + $0x1], 4294963200  ;;  %368 = vmatprep.mubr.bf16.mxu0 %v2135_v0  ;;  %s236_s12 = scalar_lea.vmem [#allocation4], %s1621_s11  ;;  %v218_v19 = vpack.c.bf16 %v2284_v18, %v2282_v17  ;;  %v2291_v21 = vld [vmem:[#allocation7 + $0x18] sm:$0xff]  ;;  %v2296_v23 = vld [vmem:[#allocation7 + $0x20] sm:$0xff]  ;;  %s2424_s18 = scalar_lea.vmem %s2942_s3, %s1566_s13 }
  0x61   : > { %v1789_v1 = vld [vmem:[%s236_s12 + $0x4] ss:$8 sps:$4 sm:$0xff]   ;;  %v1791_v2 = vld [vmem:[%s236_s12] ss:$8 sps:$4 sm:$0xff]   ;;  %v1792_v3 = vld [vmem:[%s236_s12 + $0x14] ss:$8 sps:$4 sm:$0xff]   ;;  %v219_v22 = vpack.c.bf16 %v2291_v21, %v2289_v20 }
  0x62   : > { %336 = vmatprep.subr.bf16.mxu0 %v1789_v1  ;;  %v1794_v4 = vld [vmem:[%s236_s12 + $0x10] ss:$8 sps:$4 sm:$0xff]   ;;  %v1795_v5 = vld [vmem:[%s236_s12 + $0x24] ss:$8 sps:$4 sm:$0xff]   ;;  %v1797_v6 = vld [vmem:[%s236_s12 + $0x20] ss:$8 sps:$4 sm:$0xff]  }
  0x63   : > { %337 = vmatpush1.bf16.msra.mxu0 %v1791_v2  ;;  %v1798_v7 = vld [vmem:[%s236_s12 + $0x34] ss:$8 sps:$4 sm:$0xff]   ;;  %v1800_v8 = vld [vmem:[%s236_s12 + $0x30] ss:$8 sps:$4 sm:$0xff]   ;;  %v1801_v9 = vld [vmem:[%s236_s12 + $0x44] ss:$8 sps:$4 sm:$0xff]  }
  0x64   : > { %338 = vmatprep.subr.bf16.mxu0 %v1792_v3  ;;  %v1803_v10 = vld [vmem:[%s236_s12 + $0x40] ss:$8 sps:$4 sm:$0xff]   ;;  %v1804_v11 = vld [vmem:[%s236_s12 + $0x54] ss:$8 sps:$4 sm:$0xff]   ;;  %v1806_v12 = vld [vmem:[%s236_s12 + $0x50] ss:$8 sps:$4 sm:$0xff]  }
  0x65   : > { %v1807_v13 = vld [vmem:[%s236_s12 + $0x64] ss:$8 sps:$4 sm:$0xff]   ;;  %v1809_v14 = vld [vmem:[%s236_s12 + $0x60] ss:$8 sps:$4 sm:$0xff]   ;;  %v1810_v15 = vld [vmem:[%s236_s12 + $0x74] ss:$8 sps:$4 sm:$0xff]  }
  0x66   : > { %v1812_v16 = vld [vmem:[%s236_s12 + $0x70] ss:$8 sps:$4 sm:$0xff]   ;;  %v2298_v24 = vld [vmem:[#allocation7 + $0x28] sm:$0xff]  ;;  %v2310_v29 = vld [vmem:[#allocation7 + $0x40] sm:$0xff]  ;;  %p1764_p5 = scmp.eq.s32.totalorder %s2169_s16, 1 }
  0x67   : > { %339 = vmatpush1.bf16.msra.mxu0 %v1794_v4  ;;  %v220_v25 = vpack.c.bf16 %v2298_v24, %v2296_v23  ;;  %v2303_v26 = vld [vmem:[#allocation7 + $0x30] sm:$0xff]  ;;  %v2305_v27 = vld [vmem:[#allocation7 + $0x38] sm:$0xff]  ;;  %v2312_v30 = vld [vmem:[#allocation7 + $0x48] sm:$0xff] }
  0x68   : > { %340 = vmatprep.subr.bf16.mxu0 %v1795_v5  ;;  %v221_v28 = vpack.c.bf16 %v2305_v27, %v2303_v26  ;;  %v222_v31 = vpack.c.bf16 %v2312_v30, %v2310_v29  ;;  %v2317_v32 = vld [vmem:[#allocation7 + $0x50] sm:$0xff]  ;;  %v2319_v33 = vld [vmem:[#allocation7 + $0x58] sm:$0xff]  ;;  %v2324_v35 = vld [vmem:[#allocation7 + $0x60] sm:$0xff]  ;;  %p2075_p10 = pnand %p2060_p9, %p1764_p5 }
  0x69   : > { %v223_v34 = vpack.c.bf16 %v2319_v33, %v2317_v32  ;;  %v2326_v36 = vld [vmem:[#allocation7 + $0x68] sm:$0xff]  ;;  %v2331_v38 = vld [vmem:[#allocation7 + $0x70] sm:$0xff]  ;;  %v2333_v39 = vld [vmem:[#allocation7 + $0x78] sm:$0xff] }
  0x6a   : > { %v224_v37 = vpack.c.bf16 %v2326_v36, %v2324_v35  ;;  %v225_v40 = vpack.c.bf16 %v2333_v39, %v2331_v38  ;;  %v2338_v41 = vld [vmem:[#allocation7 + $0x80] sm:$0xff]  ;;  %v2340_v42 = vld [vmem:[#allocation7 + $0x88] sm:$0xff]  ;;  %v2345_v44 = vld [vmem:[#allocation7 + $0x90] sm:$0xff]  ;;  %p2076_p11 = pneg %p2075_p10 }
  0x6b   : > { %341 = vmatpush1.bf16.msra.mxu0 %v1797_v6  ;;  %v226_v43 = vpack.c.bf16 %v2340_v42, %v2338_v41  ;;  %v205_v45 = vld [vmem:[#allocation7 + $0x98] sm:$0xff]  ;;  %v206_v47 = vld [vmem:[#allocation7 + $0xa0] sm:$0xff]  ;;  %v207_v48 = vld [vmem:[#allocation7 + $0xa8] sm:$0xff] }
  0x6c   : > { %342 = vmatprep.subr.bf16.mxu0 %v1798_v7  ;;  %v227_v46 = vpack.c.bf16 %v205_v45, %v2345_v44  ;;  %v228_v49 = vpack.c.bf16 %v207_v48, %v206_v47  ;;  %v208_v50 = vld [vmem:[#allocation7 + $0xb0] sm:$0xff]  ;;  %v209_v51 = vld [vmem:[#allocation7 + $0xb8] sm:$0xff]  ;;  %v210_v53 = vld [vmem:[#allocation7 + $0xc0] sm:$0xff]  ;;  %p2083_p12 = pnand %p2076_p11, %p2260_p1 }
  0x6d   : > { %v229_v52 = vpack.c.bf16 %v209_v51, %v208_v50  ;;  %v211_v54 = vld [vmem:[#allocation7 + $0xc8] sm:$0xff]  ;;  %v212_v56 = vld [vmem:[#allocation7 + $0xd0] sm:$0xff]  ;;  %v213_v57 = vld [vmem:[#allocation7 + $0xd8] sm:$0xff] }
  0x6e   : > { %v230_v55 = vpack.c.bf16 %v211_v54, %v210_v53  ;;  %v231_v58 = vpack.c.bf16 %v213_v57, %v212_v56  ;;  %v214_v59 = vld [vmem:[#allocation7 + $0xe0] sm:$0xff]  ;;  %v215_v60 = vld [vmem:[#allocation7 + $0xe8] sm:$0xff]  ;;  %v216_v62 = vld [vmem:[#allocation7 + $0xf0] sm:$0xff] }
  0x6f   : > { %343 = vmatpush1.bf16.msra.mxu0 %v1800_v8  ;;  %v232_v61 = vpack.c.bf16 %v215_v60, %v214_v59  ;;  %v217_v63 = vld [vmem:[#allocation7 + $0xf8] sm:$0xff]  ;;  %v530_v2 = vld [vmem:[#allocation2 + $0x8] sm:$0xff] }
  0x70   : > { %344 = vmatprep.subr.bf16.mxu0 %v1801_v9  ;;  %v233_v1 = vpack.c.bf16 %v217_v63, %v216_v62  ;;  %613 = vmatprep.mubr.bf16.mxu1 %v530_v2 }
  0x73   : > { %345 = vmatpush1.bf16.msra.mxu0 %v1803_v10 }
  0x74   : > { %346 = vmatprep.subr.bf16.mxu0 %v1804_v11 }
  0x77   : > { %347 = vmatpush1.bf16.msra.mxu0 %v1806_v12 }
  0x78   : > { %348 = vmatprep.subr.bf16.mxu0 %v1807_v13 }
  0x7b   : > { %349 = vmatpush1.bf16.msra.mxu0 %v1809_v14 }
  0x7c   : > { %350 = vmatprep.subr.bf16.mxu0 %v1810_v15 }
  0x7f   : > { %351 = vmatpush1.bf16.msra.mxu0 %v1812_v16 }
  0x82   : > { %369 = vmatmul.mubr.bf16.vlgmr.msra.gmra.mrb[0].mxu0 %v218_v19 }
  0x83   : > { %378 = vmatprep.mubr.bf16.mxu0 %v2135_v0 }
  0x8a   : > { %379 = vmatmul.mubr.bf16.gmra.mrb[4].mxu0 %v219_v22 }
  0x8b   : > { %388 = vmatprep.mubr.bf16.mxu0 %v2135_v0 }
  0x92   : > { %389 = vmatmul.mubr.bf16.gmra.mrb[8].mxu0 %v220_v25 }
  0x93   : > { %398 = vmatprep.mubr.bf16.mxu0 %v2135_v0 }
  0x9a   : > { %399 = vmatmul.mubr.bf16.gmra.mrb[12].mxu0 %v221_v28 }
  0x9b   : > { %408 = vmatprep.mubr.bf16.mxu0 %v2135_v0 }
  0xa2   : > { %409 = vmatmul.mubr.bf16.gmra.mrb[16].mxu0 %v222_v31 }
  0xa3   : > { %418 = vmatprep.mubr.bf16.mxu0 %v2135_v0 }
  0xaa   : > { %419 = vmatmul.mubr.bf16.gmra.mrb[20].mxu0 %v223_v34 }
  0xab   : > { %428 = vmatprep.mubr.bf16.mxu0 %v2135_v0 }
  0xb2   : > { %429 = vmatmul.mubr.bf16.gmra.mrb[24].mxu0 %v224_v37 }
  0xb3   : > { %438 = vmatprep.mubr.bf16.mxu0 %v2135_v0 }
  0xba   : > { %439 = vmatmul.mubr.bf16.gmra.mrb[28].mxu0 %v225_v40 }
  0xbb   : > { %448 = vmatprep.mubr.bf16.mxu0 %v2135_v0 }
  0xc2   : > { %449 = vmatmul.mubr.bf16.gmra.mrb[32].mxu0 %v226_v43 }
  0xc3   : > { %458 = vmatprep.mubr.bf16.mxu0 %v2135_v0 }
  0xca   : > { %459 = vmatmul.mubr.bf16.gmra.mrb[36].mxu0 %v227_v46 }
  0xcb   : > { %468 = vmatprep.mubr.bf16.mxu0 %v2135_v0 }
  0xd2   : > { %469 = vmatmul.mubr.bf16.gmra.mrb[40].mxu0 %v228_v49 }
  0xd3   : > { %478 = vmatprep.mubr.bf16.mxu0 %v2135_v0 }
  0xda   : > { %479 = vmatmul.mubr.bf16.gmra.mrb[44].mxu0 %v229_v52 }
  0xdb   : > { %488 = vmatprep.mubr.bf16.mxu0 %v2135_v0 }
  0xe2   : > { %489 = vmatmul.mubr.bf16.gmra.mrb[48].mxu0 %v230_v55 }
  0xe3   : > { %498 = vmatprep.mubr.bf16.mxu0 %v2135_v0 }
  0xea   : > { %499 = vmatmul.mubr.bf16.gmra.mrb[52].mxu0 %v231_v58 }
  0xeb   : > { %508 = vmatprep.mubr.bf16.mxu0 %v2135_v0 }
  0xf2   : > { %509 = vmatmul.mubr.bf16.gmra.mrb[56].mxu0 %v232_v61 }
  0xf3   : > { %518 = vmatprep.mubr.bf16.mxu0 %v2135_v0 }
  0xfa   : > { %519 = vmatmul.mubr.bf16.gmra.mrb[60].mxu0 %v233_v1 }
 0x155   : > { %v370_v3 = vpop.f32.mrb[0].mxu0 }
 0x156   : > { %v2354_v4 = vpop.f32.mrb[1].mxu0 }
 0x157   : > { %v374_v5 = vpop.f32.mrb[2].mxu0 }
 0x158   : > { %v561_v6 = vpack.c.bf16 %v374_v5, %v370_v3  ;;  %v2356_v7 = vpop.f32.mrb[3].mxu0 }
 0x15d   : > { %v380_v8 = vpop.f32.mrb[4].mxu0 }
 0x15e   : > { %v2358_v9 = vpop.f32.mrb[5].mxu0 }
 0x15f   : > { %v384_v10 = vpop.f32.mrb[6].mxu0 }
 0x160   : > { %v562_v11 = vpack.c.bf16 %v384_v10, %v380_v8  ;;  %v2360_v12 = vpop.f32.mrb[7].mxu0 }
 0x165   : > { %v390_v0 = vpop.f32.mrb[8].mxu0 }
 0x166   : > { %v2362_v13 = vpop.f32.mrb[9].mxu0 }
 0x167   : > { %v394_v14 = vpop.f32.mrb[10].mxu0 }
 0x168   : > { %v563_v15 = vpack.c.bf16 %v394_v14, %v390_v0  ;;  %v2364_v16 = vpop.f32.mrb[11].mxu0 }
 0x16d   : > { %v400_v19 = vpop.f32.mrb[12].mxu0 }
 0x16e   : > { %v2366_v22 = vpop.f32.mrb[13].mxu0 }
 0x16f   : > { %v404_v25 = vpop.f32.mrb[14].mxu0 }
 0x170   : > { %v564_v28 = vpack.c.bf16 %v404_v25, %v400_v19  ;;  %v2368_v31 = vpop.f32.mrb[15].mxu0 }
 0x175   : > { %v410_v34 = vpop.f32.mrb[16].mxu0 }
 0x176   : > { %v2370_v37 = vpop.f32.mrb[17].mxu0 }
 0x177   : > { %v414_v40 = vpop.f32.mrb[18].mxu0 }
 0x178   : > { %v565_v43 = vpack.c.bf16 %v414_v40, %v410_v34  ;;  %v2372_v45 = vpop.f32.mrb[19].mxu0 }
 0x17d   : > { %v420_v46 = vpop.f32.mrb[20].mxu0 }
 0x17e   : > { %v2374_v47 = vpop.f32.mrb[21].mxu0 }
 0x17f   : > { %v424_v48 = vpop.f32.mrb[22].mxu0 }
 0x180   : > { %v566_v49 = vpack.c.bf16 %v424_v48, %v420_v46  ;;  %v2376_v50 = vpop.f32.mrb[23].mxu0 }
 0x185   : > { %v430_v51 = vpop.f32.mrb[24].mxu0 }
 0x186   : > { %v2378_v52 = vpop.f32.mrb[25].mxu0 }
 0x187   : > { %v434_v53 = vpop.f32.mrb[26].mxu0 }
 0x188   : > { %v567_v54 = vpack.c.bf16 %v434_v53, %v430_v51  ;;  %v2380_v55 = vpop.f32.mrb[27].mxu0 }
 0x18d   : > { %v440_v56 = vpop.f32.mrb[28].mxu0 }
 0x18e   : > { %v2382_v57 = vpop.f32.mrb[29].mxu0 }
 0x18f   : > { %v444_v58 = vpop.f32.mrb[30].mxu0 }
 0x190   : > { %v568_v59 = vpack.c.bf16 %v444_v58, %v440_v56  ;;  %v2384_v60 = vpop.f32.mrb[31].mxu0 }
 0x195   : > { %v450_v61 = vpop.f32.mrb[32].mxu0 }
 0x196   : > { %v2386_v62 = vpop.f32.mrb[33].mxu0 }
 0x197   : > { %v454_v63 = vpop.f32.mrb[34].mxu0 }
 0x198   : > { %v2388_v1 = vpop.f32.mrb[35].mxu0  ;;  %v569_v2 = vpack.c.bf16 %v454_v63, %v450_v61 }
 0x19a   : > { %1622 = vmatprep.subr.bf16.mxu1 %v569_v2 }
 0x19b   : > { %1623 = vmatpush3.bf16.msra.mxu1 %v561_v6 }
 0x19d   : > { %v460_v3 = vpop.f32.mrb[36].mxu0 }
 0x19e   : > { %v2390_v5 = vpop.f32.mrb[37].mxu0 }
 0x19f   : > { %v464_v8 = vpop.f32.mrb[38].mxu0 }
 0x1a0   : > { %v570_v10 = vpack.c.bf16 %v464_v8, %v460_v3  ;;  %v2392_v0 = vpop.f32.mrb[39].mxu0 }
 0x1a2   : > { %1624 = vmatprep.subr.bf16.mxu1 %v570_v10 }
 0x1a3   : > { %1625 = vmatpush3.bf16.msra.mxu1 %v562_v11 }
 0x1a5   : > { %v470_v14 = vpop.f32.mrb[40].mxu0 }
 0x1a6   : > { %v2394_v19 = vpop.f32.mrb[41].mxu0 }
 0x1a7   : > { %v474_v25 = vpop.f32.mrb[42].mxu0 }
 0x1a8   : > { %v571_v34 = vpack.c.bf16 %v474_v25, %v470_v14  ;;  %v2396_v40 = vpop.f32.mrb[43].mxu0 }
 0x1aa   : > { %1626 = vmatprep.subr.bf16.mxu1 %v571_v34 }
 0x1ab   : > { %1627 = vmatpush3.bf16.msra.mxu1 %v563_v15 }
 0x1ad   : > { %v480_v46 = vpop.f32.mrb[44].mxu0 }
 0x1ae   : > { %v2398_v6 = vpop.f32.mrb[45].mxu0 }
 0x1af   : > { %v484_v48 = vpop.f32.mrb[46].mxu0 }
 0x1b0   : > { %v572_v51 = vpack.c.bf16 %v484_v48, %v480_v46  ;;  %v2400_v53 = vpop.f32.mrb[47].mxu0 }
 0x1b2   : > { %1628 = vmatprep.subr.bf16.mxu1 %v572_v51 }
 0x1b3   : > { %1629 = vmatpush3.bf16.msra.mxu1 %v564_v28 }
 0x1b5   : > { %v490_v56 = vpop.f32.mrb[48].mxu0 }
 0x1b6   : > { %v2402_v11 = vpop.f32.mrb[49].mxu0 }
 0x1b7   : > { %v494_v58 = vpop.f32.mrb[50].mxu0 }
 0x1b8   : > { %v573_v61 = vpack.c.bf16 %v494_v58, %v490_v56  ;;  %v2404_v63 = vpop.f32.mrb[51].mxu0 }
 0x1ba   : > { %1630 = vmatprep.subr.bf16.mxu1 %v573_v61  ;;  %v529_v61 = vld [vmem:[#allocation2] sm:$0xff] }
 0x1bb   : > { %1631 = vmatpush3.bf16.msra.mxu1 %v565_v43 }
 0x1bd   : > { %v500_v2 = vpop.f32.mrb[52].mxu0 }
 0x1be   : > { %v2406_v15 = vpop.f32.mrb[53].mxu0 }
 0x1bf   : > { %v504_v3 = vpop.f32.mrb[54].mxu0 }
 0x1c0   : > { %v574_v8 = vpack.c.bf16 %v504_v3, %v500_v2  ;;  %v2408_v10 = vpop.f32.mrb[55].mxu0  ;;  %v531_v2 = vld [vmem:[#allocation2 + $0x10] sm:$0xff]  ;;  %v534_v3 = vld [vmem:[#allocation2 + $0x28] sm:$0xff] }
 0x1c2   : > { %1632 = vmatprep.subr.bf16.mxu1 %v574_v8  ;;  %v533_v8 = vld [vmem:[#allocation2 + $0x20] sm:$0xff] }
 0x1c3   : > { %1633 = vmatpush3.bf16.msra.mxu1 %v566_v49  ;;  %v532_v49 = vld [vmem:[#allocation2 + $0x18] sm:$0xff] }
 0x1c5   : > { %v510_v14 = vpop.f32.mrb[56].mxu0 }
 0x1c6   : > { %v2410_v28 = vpop.f32.mrb[57].mxu0 }
 0x1c7   : > { %v514_v25 = vpop.f32.mrb[58].mxu0 }
 0x1c8   : > { %v575_v34 = vpack.c.bf16 %v514_v25, %v510_v14  ;;  %v2412_v46 = vpop.f32.mrb[59].mxu0  ;;  %v536_v14 = vld [vmem:[#allocation2 + $0x38] sm:$0xff]  ;;  %v538_v25 = vld [vmem:[#allocation2 + $0x48] sm:$0xff] }
 0x1ca   : > { %1634 = vmatprep.subr.bf16.mxu1 %v575_v34  ;;  %v537_v34 = vld [vmem:[#allocation2 + $0x40] sm:$0xff] }
 0x1cb   : > { %1635 = vmatpush3.bf16.msra.mxu1 %v567_v54  ;;  %v535_v54 = vld [vmem:[#allocation2 + $0x30] sm:$0xff] }
 0x1cd   : > { %v520_v48 = vpop.f32.mrb[60].mxu0 }
 0x1ce   : > { %v2414_v43 = vpop.f32.mrb[61].mxu0 }
 0x1cf   : > { %2972 = vst [vmem:[#allocation19_spill] sm:$0xff] %v2414_v43  ;;  %v524_v51 = vpop.f32.mrb[62].mxu0 }
 0x1d0   : > { %v576_v56 = vpack.c.bf16 %v524_v51, %v520_v48  ;;  %v2416_v58 = vpop.f32.mrb[63].mxu0  ;;  %v540_v48 = vld [vmem:[#allocation2 + $0x58] sm:$0xff]  ;;  %v542_v51 = vld [vmem:[#allocation2 + $0x68] sm:$0xff] }
 0x1d1   : > { %2973 = vst [vmem:[#allocation20_spill] sm:$0xff] %v2416_v58 }
 0x1d2   : > { %1636 = vmatprep.subr.bf16.mxu1 %v576_v56  ;;  %v541_v56 = vld [vmem:[#allocation2 + $0x60] sm:$0xff] }
 0x1d3   : > { %1637 = vmatpush3.bf16.msra.mxu1 %v568_v59  ;;  %v539_v59 = vld [vmem:[#allocation2 + $0x50] sm:$0xff] }
 0x1d6   : > { %614 = vmatmul.mubr.bf16.vlgmr.msra.gmra.mrb[0].mxu1 %v529_v61  ;;  %v544_v61 = vld [vmem:[#allocation2 + $0x78] sm:$0xff] }
 0x1d7   : > { %621 = vmatprep.mubr.bf16.mxu1 %v532_v49  ;;  %v543_v49 = vld [vmem:[#allocation2 + $0x70] sm:$0xff] }
 0x1de   : > { %622 = vmatmul.mubr.bf16.gmra.mrb[4].mxu1 %v531_v2  ;;  %v546_v2 = vld [vmem:[#allocation2 + $0x88] sm:$0xff] }
 0x1df   : > { %629 = vmatprep.mubr.bf16.mxu1 %v534_v3  ;;  %v545_v3 = vld [vmem:[#allocation2 + $0x80] sm:$0xff] }
 0x1e6   : > { %630 = vmatmul.mubr.bf16.gmra.mrb[8].mxu1 %v533_v8  ;;  %v548_v8 = vld [vmem:[#allocation2 + $0x98] sm:$0xff] }
 0x1e7   : > { %637 = vmatprep.mubr.bf16.mxu1 %v536_v14  ;;  %v547_v14 = vld [vmem:[#allocation2 + $0x90] sm:$0xff] }
 0x1ee   : > { %638 = vmatmul.mubr.bf16.gmra.mrb[12].mxu1 %v535_v54  ;;  %v550_v54 = vld [vmem:[#allocation2 + $0xa8] sm:$0xff] }
 0x1ef   : > { %645 = vmatprep.mubr.bf16.mxu1 %v538_v25  ;;  %v549_v25 = vld [vmem:[#allocation2 + $0xa0] sm:$0xff] }
 0x1f6   : > { %646 = vmatmul.mubr.bf16.gmra.mrb[16].mxu1 %v537_v34  ;;  %v552_v34 = vld [vmem:[#allocation2 + $0xb8] sm:$0xff] }
 0x1f7   : > { %653 = vmatprep.mubr.bf16.mxu1 %v540_v48  ;;  %v551_v48 = vld [vmem:[#allocation2 + $0xb0] sm:$0xff] }
 0x1fe   : > { %654 = vmatmul.mubr.bf16.gmra.mrb[20].mxu1 %v539_v59  ;;  %v554_v59 = vld [vmem:[#allocation2 + $0xc8] sm:$0xff] }
 0x1ff   : > { %661 = vmatprep.mubr.bf16.mxu1 %v542_v51  ;;  %v553_v51 = vld [vmem:[#allocation2 + $0xc0] sm:$0xff] }
 0x206   : > { %662 = vmatmul.mubr.bf16.gmra.mrb[24].mxu1 %v541_v56  ;;  %v556_v56 = vld [vmem:[#allocation2 + $0xd8] sm:$0xff] }
 0x207   : > { %669 = vmatprep.mubr.bf16.mxu1 %v544_v61  ;;  %v555_v61 = vld [vmem:[#allocation2 + $0xd0] sm:$0xff] }
 0x20e   : > { %670 = vmatmul.mubr.bf16.gmra.mrb[28].mxu1 %v543_v49  ;;  %v558_v49 = vld [vmem:[#allocation2 + $0xe8] sm:$0xff] }
 0x20f   : > { %677 = vmatprep.mubr.bf16.mxu1 %v546_v2  ;;  %v557_v2 = vld [vmem:[#allocation2 + $0xe0] sm:$0xff] }
 0x216   : > { %678 = vmatmul.mubr.bf16.gmra.mrb[32].mxu1 %v545_v3  ;;  %v560_v3 = vld [vmem:[#allocation2 + $0xf8] sm:$0xff] }
 0x217   : > { %685 = vmatprep.mubr.bf16.mxu1 %v548_v8  ;;  %v559_v8 = vld [vmem:[#allocation2 + $0xf0] sm:$0xff] }
 0x21e   : > { %686 = vmatmul.mubr.bf16.gmra.mrb[36].mxu1 %v547_v14  ;;  %v577_v14 = vlaneseq }
 0x21f   : > { %693 = vmatprep.mubr.bf16.mxu1 %v550_v54 }
 0x220   : > { %v2419_v54 = vshrl.u32 %v577_v14, 7 }
 0x222   : > { %2974 = vst [vmem:[#allocation21_spill] sm:$0xff] %v2419_v54 }
 0x226   : > { %694 = vmatmul.mubr.bf16.gmra.mrb[40].mxu1 %v549_v25  ;;  %v744_v25 = vsub.s32 1, %v2419_v54 }
 0x227   : > { %701 = vmatprep.mubr.bf16.mxu1 %v552_v34  ;;  %v255_v34 = vld [vmem:[%s2424_s18] sm:$0xf] }
 0x22e   : > { %702 = vmatmul.mubr.bf16.gmra.mrb[44].mxu1 %v551_v48  ;;  %v2428_v48 = vrot.slane %v255_v34, %v744_v25 }
 0x22f   : > { %709 = vmatprep.mubr.bf16.mxu1 %v554_v59 }
 0x230   : > { %v746_v59 = vadd.f32 %v2428_v48, %v2354_v4  ;;  %v750_v14 = vadd.f32 %v2428_v48, %v2362_v13  ;;  %v753_v13 = vadd.f32 %v2428_v48, %v2368_v31 }
 0x236   : > { %710 = vmatmul.mubr.bf16.gmra.mrb[48].mxu1 %v553_v51  ;;  %v747_v51 = vadd.f32 %v2428_v48, %v2356_v7  ;;  %v751_v7 = vadd.f32 %v2428_v48, %v2364_v16 }
 0x237   : > { %717 = vmatprep.mubr.bf16.mxu1 %v556_v56  ;;  %v1583_v56 = vmul.f32 -1.442695, %v746_v59  ;;  %v1587_v59 = vmul.f32 -1.442695, %v750_v14 }
 0x239   : > { %1813 = vpow2.f32 %v1583_v56  ;;  %v1588_v56 = vmul.f32 -1.442695, %v751_v7 }
 0x23e   : > { %718 = vmatmul.mubr.bf16.gmra.mrb[52].mxu1 %v555_v61  ;;  %v1584_v61 = vmul.f32 -1.442695, %v747_v51 }
 0x23f   : > { %725 = vmatprep.mubr.bf16.mxu1 %v558_v49  ;;  %v748_v49 = vadd.f32 %v2428_v48, %v2358_v9  ;;  %v752_v9 = vadd.f32 %v2428_v48, %v2366_v22 }
 0x240   : > { %1815 = vpow2.f32 %v1584_v61 }
 0x243   : > { %v1814_v4 = vpop.eup %1813 }
 0x244   : > { %v874_v51 = vadd.f32 1.0, %v1814_v4 }
 0x246   : > { %726 = vmatmul.mubr.bf16.gmra.mrb[56].mxu1 %v557_v2  ;;  %v749_v2 = vadd.f32 %v2428_v48, %v2360_v12 }
 0x247   : > { %733 = vmatprep.mubr.bf16.mxu1 %v560_v3  ;;  %v1585_v3 = vmul.f32 -1.442695, %v748_v49  ;;  %v1589_v49 = vmul.f32 -1.442695, %v752_v9  ;;  %v755_v9 = vadd.f32 %v2428_v48, %v2372_v45 }
 0x249   : > { %1817 = vpow2.f32 %v1585_v3 }
 0x24a   : > { %v1816_v25 = vpop.eup %1815 }
 0x24b   : > { %v875_v61 = vadd.f32 1.0, %v1816_v25  ;;  %v754_v25 = vadd.f32 %v2428_v48, %v2370_v37 }
 0x24e   : > { %734 = vmatmul.mubr.bf16.gmra.mrb[60].mxu1 %v559_v8  ;;  %v1586_v8 = vmul.f32 -1.442695, %v749_v2  ;;  %v579_v2 = vsub.s32 0, %v2419_v54 }
 0x250   : > { %1819 = vpow2.f32 %v1586_v8  ;;  %v1590_v8 = vmul.f32 -1.442695, %v753_v13  ;;  %v2447_v4 = vrot.slane %v255_v34, %v579_v2  ;;  %v1591_v13 = vmul.f32 -1.442695, %v754_v25 }
 0x251   : > { %1821 = vpow2.f32 %v1587_v59 }
 0x252   : > { %1823 = vrcp.f32 %v874_v51 }
 0x253   : > { %v1818_v12 = vpop.eup %1817  ;;  %1825 = vpow2.f32 %v1588_v56 }
 0x254   : > { %1827 = vrcp.f32 %v875_v61  ;;  %v876_v3 = vadd.f32 1.0, %v1818_v12 }
 0x255   : > { %1829 = vpow2.f32 %v1589_v49 }
 0x256   : > { %1831 = vrcp.f32 %v876_v3 }
 0x257   : > { %1833 = vpow2.f32 %v1590_v8 }
 0x25a   : > { %v1820_v16 = vpop.eup %1819 }
 0x25b   : > { %v877_v22 = vadd.f32 1.0, %v1820_v16  ;;  %v1822_v31 = vpop.eup %1821 }
 0x25c   : > { %v1824_v49 = vpop.eup %1823 }
 0x25d   : > { %1835 = vrcp.f32 %v877_v22  ;;  %v1826_v34 = vpop.eup %1825  ;;  %v756_v22 = vadd.f32 %v2428_v48, %v2374_v47 }
 0x25e   : > { %v1828_v37 = vpop.eup %1827  ;;  %v879_v58 = vadd.f32 1.0, %v1826_v34  ;;  %1837 = vpow2.f32 %v1591_v13 }
 0x25f   : > { %v1830_v43 = vpop.eup %1829 }
 0x2a9   : > { %v1638_v14 = vpop.f32.mrb[0].mxu1 }
 0x2aa   : > { %v1639_v7 = vpop.f32.mrb[1].mxu1 }
 0x2ab   : > { %v1640_v59 = vadd.f32 %v1639_v7, %v1638_v14  ;;  %v1641_v51 = vpop.f32.mrb[2].mxu1  ;;  %v878_v14 = vadd.f32 1.0, %v1822_v31  ;;  %v1592_v7 = vmul.f32 -1.442695, %v755_v9 }
 0x2ac   : > { %v1642_v56 = vpop.f32.mrb[3].mxu1 }
 0x2ad   : > { %v616_v61 = vadd.f32 %v1640_v59, %v2447_v4  ;;  %v1643_v12 = vadd.f32 %v1642_v56, %v1641_v51  ;;  %1839 = vrcp.f32 %v878_v14  ;;  %v757_v51 = vadd.f32 %v2428_v48, %v2376_v50 }
 0x2ae   : > { %1841 = vpow2.f32 %v1592_v7 }
 0x2af   : > { %v619_v2 = vadd.f32 %v1643_v12, %v2447_v4  ;;  %v970_v16 = vmul.f32 %v1824_v49, %v616_v61  ;;  %v1832_v61 = vpop.eup %1831  ;;  %1843 = vrcp.f32 %v879_v58  ;;  %v880_v12 = vadd.f32 1.0, %v1830_v43 }
 0x2b0   : > { %v1834_v47 = vpop.eup %1833  ;;  %v1593_v49 = vmul.f32 -1.442695, %v756_v22  ;;  %v1594_v50 = vmul.f32 -1.442695, %v757_v51  ;;  %v758_v43 = vadd.f32 %v2428_v48, %v2378_v52  ;;  %v759_v22 = vadd.f32 %v2428_v48, %v2380_v55 }
 0x2b1   : > { %v1644_v3 = vpop.f32.mrb[4].mxu1  ;;  %v2456_v54 = vadd.f32 %v970_v16, %v2282_v17  ;;  %v971_v8 = vmul.f32 %v1828_v37, %v619_v2  ;;  %v1836_v2 = vpop.eup %1835  ;;  %1845 = vrcp.f32 %v880_v12 }
 0x2b2   : > { %v1645_v45 = vpop.f32.mrb[5].mxu1  ;;  %1847 = vpow2.f32 %v1593_v49  ;;  %v1595_v52 = vmul.f32 -1.442695, %v758_v43 }
 0x2b3   : > { %v1646_v59 = vadd.f32 %v1645_v45, %v1644_v3  ;;  %v1647_v25 = vpop.f32.mrb[6].mxu1  ;;  %1034 = vadd.xlane.f32.xlu0 %v2456_v54  ;;  %v2465_v9 = vadd.f32 %v971_v8, %v2284_v18  ;;  %v881_v18 = vadd.f32 1.0, %v1834_v47  ;;  %1849 = vpow2.f32 %v1594_v50  ;;  %v1838_v45 = vpop.eup %1837 }
 0x2b4   : > { %v1648_v56 = vpop.f32.mrb[7].mxu1  ;;  %v882_v12 = vadd.f32 1.0, %v1838_v45  ;;  %v1596_v47 = vmul.f32 -1.442695, %v759_v22 }
 0x2b5   : > { %v624_v17 = vadd.f32 %v1646_v59, %v2447_v4  ;;  %v1649_v31 = vadd.f32 %v1648_v56, %v1647_v25  ;;  %1851 = vrcp.f32 %v881_v18 }
 0x2b6   : > { %1853 = vpow2.f32 %v1595_v52 }
 0x2b7   : > { %v627_v34 = vadd.f32 %v1649_v31, %v2447_v4  ;;  %1036 = vadd.xlane.f32.xlu0 %v2465_v9  ;;  %v972_v13 = vmul.f32 %v1832_v61, %v624_v17  ;;  %v1840_v51 = vpop.eup %1839  ;;  %1855 = vrcp.f32 %v882_v12 }
 0x2b8   : > { %v1842_v56 = vpop.eup %1841  ;;  %1857 = vpow2.f32 %v1596_v47 }
 0x2b9   : > { %v1650_v16 = vpop.f32.mrb[8].mxu1  ;;  %v2470_v37 = vadd.f32 %v972_v13, %v2289_v20  ;;  %v973_v14 = vmul.f32 %v1836_v2, %v627_v34  ;;  %v1844_v61 = vpop.eup %1843  ;;  %v883_v13 = vadd.f32 1.0, %v1842_v56  ;;  %v760_v2 = vadd.f32 %v2428_v48, %v2382_v57 }
 0x2ba   : > { %v1651_v7 = vpop.f32.mrb[9].mxu1 }
 0x2bb   : > { %v1652_v58 = vadd.f32 %v1651_v7, %v1650_v16  ;;  %v1653_v3 = vpop.f32.mrb[10].mxu1  ;;  %1038 = vadd.xlane.f32.xlu1 %v2470_v37  ;;  %v2479_v25 = vadd.f32 %v973_v14, %v2291_v21  ;;  %v1846_v18 = vpop.eup %1845  ;;  %1859 = vrcp.f32 %v883_v13 }
 0x2bc   : > { %v1654_v8 = vpop.f32.mrb[11].mxu1  ;;  %v1848_v43 = vpop.eup %1847 }
 0x2bd   : > { %v632_v20 = vadd.f32 %v1652_v58, %v2447_v4  ;;  %v1655_v59 = vadd.f32 %v1654_v8, %v1653_v3  ;;  %v1850_v57 = vpop.eup %1849  ;;  %v1597_v8 = vmul.f32 -1.442695, %v760_v2 }
 0x2bf   : > { %v635_v17 = vadd.f32 %v1655_v59, %v2447_v4  ;;  %1040 = vadd.xlane.f32.xlu1 %v2479_v25  ;;  %v974_v31 = vmul.f32 %v1840_v51, %v632_v20  ;;  %v1852_v22 = vpop.eup %1851  ;;  %v884_v20 = vadd.f32 1.0, %v1848_v43  ;;  %1861 = vpow2.f32 %v1597_v8 }
 0x2c0   : > { %v764_v8 = vadd.f32 %v2428_v48, %v2390_v5 }
 0x2c1   : > { %v1656_v49 = vpop.f32.mrb[12].mxu1  ;;  %v2484_v55 = vadd.f32 %v974_v31, %v2296_v23  ;;  %v975_v34 = vmul.f32 %v1844_v61, %v635_v17  ;;  %v761_v23 = vadd.f32 %v2428_v48, %v2384_v60  ;;  %v885_v60 = vadd.f32 1.0, %v1850_v57 }
 0x2c2   : > { %v1657_v21 = vpop.f32.mrb[13].mxu1  ;;  %v762_v31 = vadd.f32 %v2428_v48, %v2386_v62  ;;  %1863 = vrcp.f32 %v884_v20 }
 0x2c3   : > { %v1658_v50 = vadd.f32 %v1657_v21, %v1656_v49  ;;  %v1659_v16 = vpop.f32.mrb[14].mxu1  ;;  %1042 = vadd.xlane.f32.xlu0 %v2484_v55  ;;  %v2490_v14 = vadd.f32 %v975_v34, %v2298_v24  ;;  %v1598_v59 = vmul.f32 -1.442695, %v761_v23  ;;  %v1854_v34 = vpop.eup %1853 }
 0x2c4   : > { %v1660_v7 = vpop.f32.mrb[15].mxu1  ;;  %v1856_v62 = vpop.eup %1855 }
 0x2c5   : > { %v640_v58 = vadd.f32 %v1658_v50, %v2447_v4  ;;  %v1661_v3 = vadd.f32 %v1660_v7, %v1659_v16  ;;  %1044 = vadd.xlane.f32.xlu1 %v2490_v14  ;;  %1865 = vpow2.f32 %v1598_v59  ;;  %v1858_v2 = vpop.eup %1857  ;;  %v1599_v50 = vmul.f32 -1.442695, %v762_v31 }
 0x2c6   : > { %1867 = vrcp.f32 %v885_v60  ;;  %v886_v7 = vadd.f32 1.0, %v1854_v34 }
 0x2c7   : > { %v643_v45 = vadd.f32 %v1661_v3, %v2447_v4  ;;  %v976_v24 = vmul.f32 %v1846_v18, %v640_v58  ;;  %v1860_v18 = vpop.eup %1859  ;;  %v887_v3 = vadd.f32 1.0, %v1858_v2  ;;  %1869 = vpow2.f32 %v1599_v50 }
 0x2c8   : > { %1871 = vrcp.f32 %v886_v7 }
 0x2c9   : > { %v1662_v51 = vpop.f32.mrb[16].mxu1  ;;  %v2498_v56 = vadd.f32 %v976_v24, %v2303_v26  ;;  %v977_v52 = vmul.f32 %v1852_v22, %v643_v45  ;;  %v763_v26 = vadd.f32 %v2428_v48, %v2388_v1  ;;  %v1862_v59 = vpop.eup %1861 }
 0x2ca   : > { %v1663_v17 = vpop.f32.mrb[17].mxu1 }
 0x2cb   : > { %v1664_v61 = vadd.f32 %v1663_v17, %v1662_v51  ;;  %v1665_v12 = vpop.f32.mrb[18].mxu1  ;;  %1046 = vadd.xlane.f32.xlu0 %v2498_v56  ;;  %v2504_v47 = vadd.f32 %v977_v52, %v2305_v27  ;;  %v1600_v43 = vmul.f32 -1.442695, %v763_v26  ;;  %v1601_v17 = vmul.f32 -1.442695, %v764_v8 }
 0x2cc   : > { %v1666_v49 = vpop.f32.mrb[19].mxu1  ;;  %v1864_v5 = vpop.eup %1863 }
 0x2cd   : > { %v648_v13 = vadd.f32 %v1664_v61, %v2447_v4  ;;  %v1667_v21 = vadd.f32 %v1666_v49, %v1665_v12  ;;  %1048 = vadd.xlane.f32.xlu1 %v2504_v47  ;;  %1873 = vpow2.f32 %v1600_v43  ;;  %v888_v12 = vadd.f32 1.0, %v1862_v59 }
 0x2ce   : > { %1875 = vrcp.f32 %v887_v3 }
 0x2cf   : > { %v651_v16 = vadd.f32 %v1667_v21, %v2447_v4  ;;  %v978_v27 = vmul.f32 %v1856_v62, %v648_v13  ;;  %v1866_v60 = vpop.eup %1865  ;;  %1877 = vpow2.f32 %v1601_v17  ;;  %v766_v62 = vadd.f32 %v2428_v48, %v2394_v19 }
 0x2d0   : > { %v1868_v61 = vpop.eup %1867  ;;  %v889_v13 = vadd.f32 1.0, %v1866_v60  ;;  %1879 = vrcp.f32 %v888_v12 }
 0x2d1   : > { %v1668_v23 = vpop.f32.mrb[20].mxu1  ;;  %v2512_v58 = vadd.f32 %v978_v27, %v2310_v29  ;;  %v979_v1 = vmul.f32 %v1860_v18, %v651_v16  ;;  %v765_v29 = vadd.f32 %v2428_v48, %v2392_v0  ;;  %v1870_v18 = vpop.eup %1869 }
 0x2d2   : > { %v1669_v57 = vpop.f32.mrb[21].mxu1  ;;  %v1872_v19 = vpop.eup %1871  ;;  %v890_v8 = vadd.f32 1.0, %v1870_v18  ;;  %v770_v18 = vadd.f32 %v2428_v48, %v2402_v11 }
 0x2d3   : > { %v1670_v45 = vadd.f32 %v1669_v57, %v1668_v23  ;;  %v1671_v24 = vpop.f32.mrb[22].mxu1  ;;  %1050 = vadd.xlane.f32.xlu0 %v2512_v58  ;;  %v2518_v22 = vadd.f32 %v979_v1, %v2312_v30  ;;  %v1602_v49 = vmul.f32 -1.442695, %v765_v29  ;;  %v1603_v1 = vmul.f32 -1.442695, %v766_v62 }
 0x2d4   : > { %v1672_v20 = vpop.f32.mrb[23].mxu1 }
 0x2d5   : > { %v656_v51 = vadd.f32 %v1670_v45, %v2447_v4  ;;  %v1673_v52 = vadd.f32 %v1672_v20, %v1671_v24  ;;  %1052 = vadd.xlane.f32.xlu1 %v2518_v22  ;;  %1881 = vpow2.f32 %v1602_v49 }
 0x2d6   : > { %1883 = vrcp.f32 %v889_v13 }
 0x2d7   : > { %v659_v31 = vadd.f32 %v1673_v52, %v2447_v4  ;;  %v980_v30 = vmul.f32 %v1864_v5, %v656_v51  ;;  %v1874_v23 = vpop.eup %1873  ;;  %1885 = vpow2.f32 %v1603_v1  ;;  %v768_v51 = vadd.f32 %v2428_v48, %v2398_v6 }
 0x2d8   : > { %v1876_v57 = vpop.eup %1875  ;;  %v891_v59 = vadd.f32 1.0, %v1874_v23  ;;  %1887 = vrcp.f32 %v890_v8 }
 0x2d9   : > { %v1674_v34 = vpop.f32.mrb[24].mxu1  ;;  %v2526_v26 = vadd.f32 %v980_v30, %v2317_v32  ;;  %v981_v0 = vmul.f32 %v1868_v61, %v659_v31  ;;  %v767_v32 = vadd.f32 %v2428_v48, %v2396_v40  ;;  %v1878_v31 = vpop.eup %1877  ;;  %v1605_v49 = vmul.f32 -1.442695, %v768_v51 }
 0x2da   : > { %v1675_v21 = vpop.f32.mrb[25].mxu1  ;;  %v1880_v6 = vpop.eup %1879  ;;  %v892_v13 = vadd.f32 1.0, %v1878_v31 }
 0x2db   : > { %v1676_v2 = vadd.f32 %v1675_v21, %v1674_v34  ;;  %v1677_v50 = vpop.f32.mrb[26].mxu1  ;;  %1054 = vadd.xlane.f32.xlu0 %v2526_v26  ;;  %v2532_v16 = vadd.f32 %v981_v0, %v2319_v33  ;;  %v1604_v45 = vmul.f32 -1.442695, %v767_v32 }
 0x2dc   : > { %v1678_v27 = vpop.f32.mrb[27].mxu1 }
 0x2dd   : > { %v664_v7 = vadd.f32 %v1676_v2, %v2447_v4  ;;  %v1679_v43 = vadd.f32 %v1678_v27, %v1677_v50  ;;  %1056 = vadd.xlane.f32.xlu1 %v2532_v16  ;;  %1889 = vpow2.f32 %v1604_v45 }
 0x2de   : > { %1891 = vrcp.f32 %v891_v59 }
 0x2df   : > { %v667_v3 = vadd.f32 %v1679_v43, %v2447_v4  ;;  %v982_v33 = vmul.f32 %v1872_v19, %v664_v7  ;;  %v1882_v12 = vpop.eup %1881  ;;  %1893 = vpow2.f32 %v1605_v49 }
 0x2e0   : > { %v1884_v0 = vpop.eup %1883  ;;  %v893_v50 = vadd.f32 1.0, %v1882_v12  ;;  %1895 = vrcp.f32 %v892_v13 }
 0x2e1   : > { %v1680_v24 = vpop.f32.mrb[28].mxu1  ;;  %v2540_v20 = vadd.f32 %v982_v33, %v2324_v35  ;;  %v983_v40 = vmul.f32 %v1876_v57, %v667_v3  ;;  %v769_v35 = vadd.f32 %v2428_v48, %v2400_v53  ;;  %v1886_v23 = vpop.eup %1885  ;;  %v1607_v57 = vmul.f32 -1.442695, %v770_v18 }
 0x2e2   : > { %v1681_v29 = vpop.f32.mrb[29].mxu1  ;;  %v1888_v11 = vpop.eup %1887  ;;  %v774_v18 = vadd.f32 %v2428_v48, %v2410_v28 }
 0x2e3   : > { %v1682_v52 = vadd.f32 %v1681_v29, %v1680_v24  ;;  %v1683_v5 = vpop.f32.mrb[30].mxu1  ;;  %1058 = vadd.xlane.f32.xlu0 %v2540_v20  ;;  %v2546_v60 = vadd.f32 %v983_v40, %v2326_v36  ;;  %v1606_v21 = vmul.f32 -1.442695, %v769_v35  ;;  %v894_v24 = vadd.f32 1.0, %v1886_v23 }
 0x2e4   : > { %v1684_v17 = vpop.f32.mrb[31].mxu1 }
 0x2e5   : > { %v672_v30 = vadd.f32 %v1682_v52, %v2447_v4  ;;  %v1685_v61 = vadd.f32 %v1684_v17, %v1683_v5  ;;  %1060 = vadd.xlane.f32.xlu1 %v2546_v60  ;;  %1897 = vpow2.f32 %v1606_v21  ;;  %v772_v5 = vadd.f32 %v2428_v48, %v2406_v15 }
 0x2e6   : > { %1899 = vrcp.f32 %v893_v50 }
 0x2e7   : > { %v675_v34 = vadd.f32 %v1685_v61, %v2447_v4  ;;  %v984_v36 = vmul.f32 %v1880_v6, %v672_v30  ;;  %v1890_v33 = vpop.eup %1889  ;;  %1901 = vpow2.f32 %v1607_v57  ;;  %v1611_v57 = vmul.f32 -1.442695, %v774_v18 }
 0x2e8   : > { %v1892_v45 = vpop.eup %1891  ;;  %v895_v51 = vadd.f32 1.0, %v1890_v33  ;;  %1903 = vrcp.f32 %v894_v24 }
 0x2e9   : > { %v1686_v62 = vpop.f32.mrb[32].mxu1  ;;  %v2554_v2 = vadd.f32 %v984_v36, %v2331_v38  ;;  %v985_v53 = vmul.f32 %v1884_v0, %v675_v34  ;;  %v771_v38 = vadd.f32 %v2428_v48, %v2404_v63  ;;  %v1894_v61 = vpop.eup %1893  ;;  %v1609_v34 = vmul.f32 -1.442695, %v772_v5 }
 0x2ea   : > { %v1687_v27 = vpop.f32.mrb[33].mxu1  ;;  %v1896_v15 = vpop.eup %1895  ;;  %v896_v13 = vadd.f32 1.0, %v1894_v61 }
 0x2eb   : > { %v1688_v32 = vadd.f32 %v1687_v27, %v1686_v62  ;;  %v1689_v7 = vpop.f32.mrb[34].mxu1  ;;  %1062 = vadd.xlane.f32.xlu0 %v2554_v2  ;;  %v2560_v43 = vadd.f32 %v985_v53, %v2333_v39  ;;  %v1608_v40 = vmul.f32 -1.442695, %v771_v38 }
 0x2ec   : > { %v1690_v19 = vpop.f32.mrb[35].mxu1 }
 0x2ed   : > { %v680_v1 = vadd.f32 %v1688_v32, %v2447_v4  ;;  %v1691_v3 = vadd.f32 %v1690_v19, %v1689_v7  ;;  %1064 = vadd.xlane.f32.xlu1 %v2560_v43  ;;  %1905 = vpow2.f32 %v1608_v40  ;;  %v2005_v19 = vld [vmem:[#allocation7 + $0x98] sm:$0xff] }
 0x2ee   : > { %1907 = vrcp.f32 %v895_v51 }
 0x2ef   : > { %v683_v8 = vadd.f32 %v1691_v3, %v2447_v4  ;;  %v986_v39 = vmul.f32 %v1888_v11, %v680_v1  ;;  %v1898_v49 = vpop.eup %1897  ;;  %1909 = vpow2.f32 %v1609_v34 }
 0x2f0   : > { %v1900_v0 = vpop.eup %1899  ;;  %v897_v50 = vadd.f32 1.0, %v1898_v49  ;;  %1911 = vrcp.f32 %v896_v13  ;;  %v2976_v49 = vld [vmem:[#allocation20_spill] sm:$0xff] }
 0x2f1   : > { %v1692_v59 = vpop.f32.mrb[36].mxu1  ;;  %v2568_v29 = vadd.f32 %v986_v39, %v2338_v41  ;;  %v987_v63 = vmul.f32 %v1892_v45, %v683_v8  ;;  %v773_v41 = vadd.f32 %v2428_v48, %v2408_v10  ;;  %v1902_v1 = vpop.eup %1901  ;;  %v777_v34 = vadd.f32 %v2428_v48, %v2976_v49 }
 0x2f2   : > { %v1693_v52 = vpop.f32.mrb[37].mxu1  ;;  %v1904_v28 = vpop.eup %1903  ;;  %v898_v24 = vadd.f32 1.0, %v1902_v1 }
 0x2f3   : > { %v1694_v17 = vadd.f32 %v1693_v52, %v1692_v59  ;;  %v1695_v31 = vpop.f32.mrb[38].mxu1  ;;  %1066 = vadd.xlane.f32.xlu0 %v2568_v29  ;;  %v2574_v35 = vadd.f32 %v987_v63, %v2340_v42  ;;  %v1610_v21 = vmul.f32 -1.442695, %v773_v41  ;;  %v2006_v63 = vld [vmem:[#allocation7 + $0xa0] sm:$0xff]  ;;  %v2007_v41 = vld [vmem:[#allocation7 + $0xa8] sm:$0xff] }
 0x2f4   : > { %v1696_v30 = vpop.f32.mrb[39].mxu1  ;;  %v1614_v18 = vmul.f32 -1.442695, %v777_v34 }
 0x2f5   : > { %v688_v6 = vadd.f32 %v1694_v17, %v2447_v4  ;;  %v1697_v12 = vadd.f32 %v1696_v30, %v1695_v31  ;;  %1068 = vadd.xlane.f32.xlu1 %v2574_v35  ;;  %1913 = vpow2.f32 %v1610_v21  ;;  %v2975_v17 = vld [vmem:[#allocation19_spill] sm:$0xff] }
 0x2f6   : > { %1915 = vrcp.f32 %v897_v50  ;;  %v776_v31 = vadd.f32 %v2428_v48, %v2975_v17 }
 0x2f7   : > { %v691_v36 = vadd.f32 %v1697_v12, %v2447_v4  ;;  %v988_v42 = vmul.f32 %v1896_v15, %v688_v6  ;;  %v1906_v33 = vpop.eup %1905  ;;  %1917 = vpow2.f32 %v1611_v57 }
 0x2f8   : > { %v1908_v45 = vpop.eup %1907  ;;  %v899_v52 = vadd.f32 1.0, %v1906_v33  ;;  %1919 = vrcp.f32 %v898_v24  ;;  %v1613_v21 = vmul.f32 -1.442695, %v776_v31 }
 0x2f9   : > { %v1698_v62 = vpop.f32.mrb[40].mxu1  ;;  %v2582_v53 = vadd.f32 %v988_v42, %v2345_v44  ;;  %v989_v10 = vmul.f32 %v1900_v0, %v691_v36  ;;  %v775_v44 = vadd.f32 %v2428_v48, %v2412_v46  ;;  %v1910_v15 = vpop.eup %1909 }
 0x2fa   : > { %v1699_v27 = vpop.f32.mrb[41].mxu1  ;;  %v1912_v0 = vpop.eup %1911 }
 0x2fb   : > { %v1700_v32 = vadd.f32 %v1699_v27, %v1698_v62  ;;  %v1701_v7 = vpop.f32.mrb[42].mxu1  ;;  %1070 = vadd.xlane.f32.xlu0 %v2582_v53  ;;  %v2587_v23 = vadd.f32 %v2005_v19, %v989_v10  ;;  %v1612_v40 = vmul.f32 -1.442695, %v775_v44  ;;  %v900_v27 = vadd.f32 1.0, %v1910_v15  ;;  %v2011_v15 = vld [vmem:[#allocation7 + $0xc8] sm:$0xff] }
 0x2fc   : > { %v1702_v38 = vpop.f32.mrb[43].mxu1 }
 0x2fd   : > { %v696_v3 = vadd.f32 %v1700_v32, %v2447_v4  ;;  %v1703_v11 = vadd.f32 %v1702_v38, %v1701_v7  ;;  %1072 = vadd.xlane.f32.xlu1 %v2587_v23  ;;  %1921 = vpow2.f32 %v1612_v40  ;;  %v2008_v7 = vld [vmem:[#allocation7 + $0xb0] sm:$0xff] }
 0x2fe   : > { %1923 = vrcp.f32 %v899_v52 }
 0x2ff   : > { %v699_v8 = vadd.f32 %v1703_v11, %v2447_v4  ;;  %v990_v39 = vmul.f32 %v1904_v28, %v696_v3  ;;  %v1914_v13 = vpop.eup %1913  ;;  %1925 = vpow2.f32 %v1613_v21  ;;  %v2009_v11 = vld [vmem:[#allocation7 + $0xb8] sm:$0xff] }
 0x300   : > { %v1916_v50 = vpop.eup %1915  ;;  %v901_v38 = vadd.f32 1.0, %v1914_v13  ;;  %1927 = vrcp.f32 %v900_v27 }
 0x301   : > { %v1704_v59 = vpop.f32.mrb[44].mxu1  ;;  %v2594_v51 = vadd.f32 %v2006_v63, %v990_v39  ;;  %v991_v46 = vmul.f32 %v1908_v45, %v699_v8  ;;  %v1918_v57 = vpop.eup %1917  ;;  %1929 = vpow2.f32 %v1614_v18 }
 0x302   : > { %v1705_v5 = vpop.f32.mrb[45].mxu1  ;;  %v1920_v45 = vpop.eup %1919  ;;  %1931 = vrcp.f32 %v901_v38 }
 0x303   : > { %v1706_v30 = vadd.f32 %v1705_v5, %v1704_v59  ;;  %v1707_v61 = vpop.f32.mrb[46].mxu1  ;;  %1074 = vadd.xlane.f32.xlu0 %v2594_v51  ;;  %v2599_v6 = vadd.f32 %v2007_v41, %v991_v46  ;;  %v902_v46 = vadd.f32 1.0, %v1918_v57  ;;  %v2010_v5 = vld [vmem:[#allocation7 + $0xc0] sm:$0xff] }
 0x304   : > { %v1708_v12 = vpop.f32.mrb[47].mxu1 }
 0x305   : > { %v704_v36 = vadd.f32 %v1706_v30, %v2447_v4  ;;  %v1709_v42 = vadd.f32 %v1708_v12, %v1707_v61  ;;  %1076 = vadd.xlane.f32.xlu1 %v2599_v6  ;;  %1933 = vrcp.f32 %v902_v46  ;;  %v2014_v46 = vld [vmem:[#allocation7 + $0xe0] sm:$0xff] }
 0x307   : > { %v707_v62 = vadd.f32 %v1709_v42, %v2447_v4  ;;  %v992_v10 = vmul.f32 %v1912_v0, %v704_v36  ;;  %v1922_v24 = vpop.eup %1921 }
 0x308   : > { %v1924_v63 = vpop.eup %1923  ;;  %v903_v30 = vadd.f32 1.0, %v1922_v24 }
 0x309   : > { %v1710_v32 = vpop.f32.mrb[48].mxu1  ;;  %v2606_v19 = vadd.f32 %v2008_v7, %v992_v10  ;;  %v993_v48 = vmul.f32 %v1916_v50, %v707_v62  ;;  %v1926_v36 = vpop.eup %1925 }
 0x30a   : > { %v1711_v1 = vpop.f32.mrb[49].mxu1  ;;  %v1928_v13 = vpop.eup %1927  ;;  %1935 = vrcp.f32 %v903_v30  ;;  %v904_v27 = vadd.f32 1.0, %v1926_v36 }
 0x30b   : > { %v1712_v44 = vadd.f32 %v1711_v1, %v1710_v32  ;;  %v1713_v3 = vpop.f32.mrb[50].mxu1  ;;  %1078 = vadd.xlane.f32.xlu0 %v2606_v19  ;;  %v2609_v28 = vadd.f32 %v2009_v11, %v993_v48  ;;  %v1930_v21 = vpop.eup %1929  ;;  %v2012_v32 = vld [vmem:[#allocation7 + $0xd0] sm:$0xff]  ;;  %v2013_v11 = vld [vmem:[#allocation7 + $0xd8] sm:$0xff] }
 0x30c   : > { %v1714_v33 = vpop.f32.mrb[51].mxu1  ;;  %v1932_v50 = vpop.eup %1931  ;;  %v905_v38 = vadd.f32 1.0, %v1930_v21  ;;  %1937 = vrcp.f32 %v904_v27  ;;  %v2017_v27 = vld [vmem:[#allocation7 + $0xf8] sm:$0xff] }
 0x30d   : > { %v712_v8 = vadd.f32 %v1712_v44, %v2447_v4  ;;  %v1715_v39 = vadd.f32 %v1714_v33, %v1713_v3  ;;  %1080 = vadd.xlane.f32.xlu1 %v2609_v28 }
 0x30e   : > { %1939 = vrcp.f32 %v905_v38 }
 0x30f   : > { %v715_v40 = vadd.f32 %v1715_v39, %v2447_v4  ;;  %v994_v59 = vmul.f32 %v1920_v45, %v712_v8  ;;  %v1934_v45 = vpop.eup %1933 }
 0x311   : > { %v1716_v52 = vpop.f32.mrb[52].mxu1  ;;  %v2614_v17 = vadd.f32 %v2010_v5, %v994_v59  ;;  %v995_v31 = vmul.f32 %v1924_v63, %v715_v40 }
 0x312   : > { %v1717_v61 = vpop.f32.mrb[53].mxu1 }
 0x313   : > { %v1718_v41 = vadd.f32 %v1717_v61, %v1716_v52  ;;  %v1719_v12 = vpop.f32.mrb[54].mxu1  ;;  %1082 = vadd.xlane.f32.xlu0 %v2614_v17  ;;  %v2617_v49 = vadd.f32 %v2011_v15, %v995_v31 }
 0x314   : > { %v1720_v34 = vpop.f32.mrb[55].mxu1  ;;  %v1936_v59 = vpop.eup %1935 }
 0x315   : > { %v720_v42 = vadd.f32 %v1718_v41, %v2447_v4  ;;  %v1721_v0 = vadd.f32 %v1720_v34, %v1719_v12  ;;  %1084 = vadd.xlane.f32.xlu1 %v2617_v49  ;;  %v2015_v41 = vld [vmem:[#allocation7 + $0xe8] sm:$0xff] }
 0x317   : > { %v723_v62 = vadd.f32 %v1721_v0, %v2447_v4  ;;  %v996_v10 = vmul.f32 %v1928_v13, %v720_v42  ;;  %v1938_v42 = vpop.eup %1937 }
 0x318   : > { %v1940_v21 = vpop.eup %1939 }
 0x319   : > { %v1722_v18 = vpop.f32.mrb[56].mxu1  ;;  %v2622_v7 = vadd.f32 %v2012_v32, %v996_v10  ;;  %v997_v48 = vmul.f32 %v1932_v50, %v723_v62  ;;  %v2016_v62 = vld [vmem:[#allocation7 + $0xf0] sm:$0xff] }
 0x31a   : > { %v1723_v1 = vpop.f32.mrb[57].mxu1 }
 0x31b   : > { %v1724_v44 = vadd.f32 %v1723_v1, %v1722_v18  ;;  %v1725_v3 = vpop.f32.mrb[58].mxu1  ;;  %1086 = vadd.xlane.f32.xlu0 %v2622_v7  ;;  %v2625_v33 = vadd.f32 %v2013_v11, %v997_v48 }
 0x31c   : > { %v1726_v57 = vpop.f32.mrb[59].mxu1 }
 0x31d   : > { %v728_v8 = vadd.f32 %v1724_v44, %v2447_v4  ;;  %v1727_v39 = vadd.f32 %v1726_v57, %v1725_v3  ;;  %1088 = vadd.xlane.f32.xlu1 %v2625_v33 }
 0x31f   : > { %v731_v24 = vadd.f32 %v1727_v39, %v2447_v4  ;;  %v998_v40 = vmul.f32 %v1934_v45, %v728_v8 }
 0x321   : > { %v1728_v63 = vpop.f32.mrb[60].mxu1  ;;  %v2630_v52 = vadd.f32 %v2014_v46, %v998_v40  ;;  %v999_v5 = vmul.f32 %v1936_v59, %v731_v24 }
 0x322   : > { %v1729_v31 = vpop.f32.mrb[61].mxu1 }
 0x323   : > { %v1730_v30 = vadd.f32 %v1729_v31, %v1728_v63  ;;  %v1731_v61 = vpop.f32.mrb[62].mxu1  ;;  %1090 = vadd.xlane.f32.xlu0 %v2630_v52  ;;  %v2633_v12 = vadd.f32 %v2015_v41, %v999_v5 }
 0x324   : > { %v1732_v15 = vpop.f32.mrb[63].mxu1 }
 0x325   : > { %v736_v34 = vadd.f32 %v1730_v30, %v2447_v4  ;;  %v1733_v36 = vadd.f32 %v1732_v15, %v1731_v61  ;;  %1092 = vadd.xlane.f32.xlu1 %v2633_v12 }
 0x327   : > { %v739_v0 = vadd.f32 %v1733_v36, %v2447_v4  ;;  %v1000_v13 = vmul.f32 %v1938_v42, %v736_v34 }
 0x329   : > { %v2638_v10 = vadd.f32 %v2016_v62, %v1000_v13  ;;  %v1001_v50 = vmul.f32 %v1940_v21, %v739_v0 }
 0x32b   : > { %1094 = vadd.xlane.f32.xlu0 %v2638_v10  ;;  %v2641_v18 = vadd.f32 %v2017_v27, %v1001_v50 }
 0x32d   : > { %1096 = vadd.xlane.f32.xlu1 %v2641_v18 }
 0x340   : > { %v1035_v32 = vpop.xlane.xlu0 %1034 }
 0x341   : > { %v1099_v48 = vmul.f32 0.0078125, %v1035_v32 }
 0x343   : > { %v2645_v38 = vsub.f32 %v2456_v54, %v1099_v48 }
 0x344   : > { %v1037_v1 = vpop.xlane.xlu0 %1036 }
 0x345   : > { %v1100_v4 = vmul.f32 0.0078125, %v1037_v1  ;;  %v1163_v44 = vmul.f32 %v2645_v38, %v2645_v38 }
 0x347   : > { %v2650_v3 = vsub.f32 %v2465_v9, %v1100_v4  ;;  %1195 = vadd.xlane.f32.xlu0 %v1163_v44 }
 0x348   : > { %v1039_v11 = vpop.xlane.xlu1 %1038 }
 0x349   : > { %v1101_v57 = vmul.f32 0.0078125, %v1039_v11  ;;  %v1164_v8 = vmul.f32 %v2650_v3, %v2650_v3 }
 0x34b   : > { %v2655_v39 = vsub.f32 %v2470_v37, %v1101_v57  ;;  %1197 = vadd.xlane.f32.xlu1 %v1164_v8 }
 0x34c   : > { %v1041_v54 = vpop.xlane.xlu1 %1040 }
 0x34d   : > { %v1102_v45 = vmul.f32 0.0078125, %v1041_v54  ;;  %v1165_v24 = vmul.f32 %v2655_v39, %v2655_v39 }
 0x34f   : > { %v2660_v40 = vsub.f32 %v2479_v25, %v1102_v45  ;;  %1199 = vadd.xlane.f32.xlu0 %v1165_v24 }
 0x350   : > { %v1043_v9 = vpop.xlane.xlu0 %1042 }
 0x351   : > { %v1103_v59 = vmul.f32 0.0078125, %v1043_v9  ;;  %v1166_v63 = vmul.f32 %v2660_v40, %v2660_v40 }
 0x352   : > { %v1045_v46 = vpop.xlane.xlu1 %1044 }
 0x353   : > { %v2665_v5 = vsub.f32 %v2484_v55, %v1103_v59  ;;  %v1104_v37 = vmul.f32 0.0078125, %v1045_v46  ;;  %1201 = vadd.xlane.f32.xlu1 %v1166_v63 }
 0x355   : > { %v2668_v31 = vsub.f32 %v2490_v14, %v1104_v37  ;;  %v1167_v30 = vmul.f32 %v2665_v5, %v2665_v5 }
 0x357   : > { %1203 = vadd.xlane.f32.xlu0 %v1167_v30  ;;  %v1168_v25 = vmul.f32 %v2668_v31, %v2668_v31 }
 0x358   : > { %v1047_v61 = vpop.xlane.xlu0 %1046 }
 0x359   : > { %v1105_v41 = vmul.f32 0.0078125, %v1047_v61  ;;  %1205 = vadd.xlane.f32.xlu1 %v1168_v25 }
 0x35a   : > { %v1049_v15 = vpop.xlane.xlu1 %1048 }
 0x35b   : > { %v2675_v34 = vsub.f32 %v2498_v56, %v1105_v41  ;;  %v1106_v55 = vmul.f32 0.0078125, %v1049_v15 }
 0x35d   : > { %v2678_v36 = vsub.f32 %v2504_v47, %v1106_v55  ;;  %v1169_v14 = vmul.f32 %v2675_v34, %v2675_v34 }
 0x35f   : > { %1207 = vadd.xlane.f32.xlu0 %v1169_v14  ;;  %v1170_v42 = vmul.f32 %v2678_v36, %v2678_v36 }
 0x360   : > { %v1051_v0 = vpop.xlane.xlu0 %1050 }
 0x361   : > { %v1107_v13 = vmul.f32 0.0078125, %v1051_v0  ;;  %1209 = vadd.xlane.f32.xlu1 %v1170_v42 }
 0x362   : > { %v1053_v21 = vpop.xlane.xlu1 %1052 }
 0x363   : > { %v2685_v62 = vsub.f32 %v2512_v58, %v1107_v13  ;;  %v1108_v56 = vmul.f32 0.0078125, %v1053_v21 }
 0x365   : > { %v2688_v50 = vsub.f32 %v2518_v22, %v1108_v56  ;;  %v1171_v47 = vmul.f32 %v2685_v62, %v2685_v62 }
 0x367   : > { %1211 = vadd.xlane.f32.xlu0 %v1171_v47  ;;  %v1172_v27 = vmul.f32 %v2688_v50, %v2688_v50 }
 0x368   : > { %v1055_v32 = vpop.xlane.xlu0 %1054 }
 0x369   : > { %v1109_v48 = vmul.f32 0.0078125, %v1055_v32  ;;  %1213 = vadd.xlane.f32.xlu1 %v1172_v27 }
 0x36a   : > { %v1057_v1 = vpop.xlane.xlu1 %1056 }
 0x36b   : > { %v2695_v4 = vsub.f32 %v2526_v26, %v1109_v48  ;;  %v1110_v58 = vmul.f32 0.0078125, %v1057_v1 }
 0x36d   : > { %v2698_v44 = vsub.f32 %v2532_v16, %v1110_v58  ;;  %v1173_v22 = vmul.f32 %v2695_v4, %v2695_v4 }
 0x36f   : > { %1215 = vadd.xlane.f32.xlu0 %v1173_v22  ;;  %v1174_v11 = vmul.f32 %v2698_v44, %v2698_v44 }
 0x370   : > { %v1059_v57 = vpop.xlane.xlu0 %1058 }
 0x371   : > { %v1111_v8 = vmul.f32 0.0078125, %v1059_v57  ;;  %1217 = vadd.xlane.f32.xlu1 %v1174_v11 }
 0x372   : > { %v1061_v54 = vpop.xlane.xlu1 %1060 }
 0x373   : > { %v2705_v45 = vsub.f32 %v2540_v20, %v1111_v8  ;;  %v1112_v26 = vmul.f32 0.0078125, %v1061_v54 }
 0x375   : > { %v2708_v24 = vsub.f32 %v2546_v60, %v1112_v26  ;;  %v1175_v16 = vmul.f32 %v2705_v45, %v2705_v45 }
 0x377   : > { %1219 = vadd.xlane.f32.xlu0 %v1175_v16  ;;  %v1176_v9 = vmul.f32 %v2708_v24, %v2708_v24 }
 0x378   : > { %v1063_v59 = vpop.xlane.xlu0 %1062 }
 0x379   : > { %v1113_v63 = vmul.f32 0.0078125, %v1063_v59  ;;  %1221 = vadd.xlane.f32.xlu1 %v1176_v9 }
 0x37a   : > { %v1065_v46 = vpop.xlane.xlu1 %1064 }
 0x37b   : > { %v2715_v37 = vsub.f32 %v2554_v2, %v1113_v63  ;;  %v1114_v20 = vmul.f32 0.0078125, %v1065_v46 }
 0x37d   : > { %v2718_v30 = vsub.f32 %v2560_v43, %v1114_v20  ;;  %v1177_v60 = vmul.f32 %v2715_v37, %v2715_v37 }
 0x37f   : > { %1223 = vadd.xlane.f32.xlu0 %v1177_v60  ;;  %v1178_v25 = vmul.f32 %v2718_v30, %v2718_v30 }
 0x380   : > { %v1067_v61 = vpop.xlane.xlu0 %1066 }
 0x381   : > { %v1115_v41 = vmul.f32 0.0078125, %v1067_v61  ;;  %1225 = vadd.xlane.f32.xlu1 %v1178_v25 }
 0x382   : > { %v1069_v15 = vpop.xlane.xlu1 %1068 }
 0x383   : > { %v2725_v55 = vsub.f32 %v2568_v29, %v1115_v41  ;;  %v1116_v2 = vmul.f32 0.0078125, %v1069_v15 }
 0x385   : > { %v2728_v14 = vsub.f32 %v2574_v35, %v1116_v2  ;;  %v1179_v43 = vmul.f32 %v2725_v55, %v2725_v55 }
 0x387   : > { %1227 = vadd.xlane.f32.xlu0 %v1179_v43  ;;  %v1180_v42 = vmul.f32 %v2728_v14, %v2728_v14 }
 0x388   : > { %v1071_v0 = vpop.xlane.xlu0 %1070 }
 0x389   : > { %v1117_v13 = vmul.f32 0.0078125, %v1071_v0  ;;  %1229 = vadd.xlane.f32.xlu1 %v1180_v42 }
 0x38a   : > { %v1073_v21 = vpop.xlane.xlu1 %1072 }
 0x38b   : > { %v2735_v56 = vsub.f32 %v2582_v53, %v1117_v13  ;;  %v1118_v29 = vmul.f32 0.0078125, %v1073_v21 }
 0x38d   : > { %v2738_v47 = vsub.f32 %v2587_v23, %v1118_v29  ;;  %v1181_v35 = vmul.f32 %v2735_v56, %v2735_v56 }
 0x38f   : > { %1231 = vadd.xlane.f32.xlu0 %v1181_v35  ;;  %v1182_v27 = vmul.f32 %v2738_v47, %v2738_v47 }
 0x390   : > { %v1075_v32 = vpop.xlane.xlu0 %1074 }
 0x391   : > { %v1119_v48 = vmul.f32 0.0078125, %v1075_v32  ;;  %1233 = vadd.xlane.f32.xlu1 %v1182_v27 }
 0x392   : > { %v1077_v1 = vpop.xlane.xlu1 %1076 }
 0x393   : > { %v2745_v58 = vsub.f32 %v2594_v51, %v1119_v48  ;;  %v1120_v53 = vmul.f32 0.0078125, %v1077_v1 }
 0x395   : > { %v2748_v22 = vsub.f32 %v2599_v6, %v1120_v53  ;;  %v1183_v23 = vmul.f32 %v2745_v58, %v2745_v58 }
 0x397   : > { %1235 = vadd.xlane.f32.xlu0 %v1183_v23  ;;  %v1184_v11 = vmul.f32 %v2748_v22, %v2748_v22 }
 0x398   : > { %v1079_v57 = vpop.xlane.xlu0 %1078 }
 0x399   : > { %v1121_v8 = vmul.f32 0.0078125, %v1079_v57  ;;  %1237 = vadd.xlane.f32.xlu1 %v1184_v11 }
 0x39a   : > { %v1081_v54 = vpop.xlane.xlu1 %1080 }
 0x39b   : > { %v2755_v26 = vsub.f32 %v2606_v19, %v1121_v8  ;;  %v1122_v51 = vmul.f32 0.0078125, %v1081_v54 }
 0x39d   : > { %v2758_v16 = vsub.f32 %v2609_v28, %v1122_v51  ;;  %v1185_v6 = vmul.f32 %v2755_v26, %v2755_v26 }
 0x39f   : > { %1239 = vadd.xlane.f32.xlu0 %v1185_v6  ;;  %v1186_v9 = vmul.f32 %v2758_v16, %v2758_v16 }
 0x3a0   : > { %v1083_v59 = vpop.xlane.xlu0 %1082 }
 0x3a1   : > { %v1123_v63 = vmul.f32 0.0078125, %v1083_v59  ;;  %1241 = vadd.xlane.f32.xlu1 %v1186_v9  ;;  %v2977_v59 = vld [vmem:[#allocation21_spill] sm:$0xff] }
 0x3a2   : > { %v1085_v46 = vpop.xlane.xlu1 %1084 }
 0x3a3   : > { %v2765_v20 = vsub.f32 %v2614_v17, %v1123_v63  ;;  %v1124_v19 = vmul.f32 0.0078125, %v1085_v46  ;;  %v1389_v63 = vsub.s32 2, %v2977_v59 }
 0x3a5   : > { %v2768_v60 = vsub.f32 %v2617_v49, %v1124_v19  ;;  %v1187_v28 = vmul.f32 %v2765_v20, %v2765_v20  ;;  %v1425_v19 = vsub.s32 3, %v2977_v59 }
 0x3a7   : > { %1243 = vadd.xlane.f32.xlu0 %v1187_v28  ;;  %v1188_v25 = vmul.f32 %v2768_v60, %v2768_v60 }
 0x3a8   : > { %v1087_v61 = vpop.xlane.xlu0 %1086 }
 0x3a9   : > { %v1125_v41 = vmul.f32 0.0078125, %v1087_v61  ;;  %1245 = vadd.xlane.f32.xlu1 %v1188_v25  ;;  %v2018_v61 = vld [vmem:[%s2424_s18] sm:$0xf] }
 0x3aa   : > { %v1089_v15 = vpop.xlane.xlu1 %1088 }
 0x3ab   : > { %v2775_v2 = vsub.f32 %v2622_v7, %v1125_v41  ;;  %v1126_v17 = vmul.f32 0.0078125, %v1089_v15  ;;  %v2807_v41 = vrot.slane %v2018_v61, %v1389_v63 }
 0x3ad   : > { %v2778_v43 = vsub.f32 %v2625_v33, %v1126_v17  ;;  %v1189_v49 = vmul.f32 %v2775_v2, %v2775_v2 }
 0x3af   : > { %1247 = vadd.xlane.f32.xlu0 %v1189_v49  ;;  %v1190_v42 = vmul.f32 %v2778_v43, %v2778_v43  ;;  %v2809_v49 = vrot.slane %v2018_v61, %v1425_v19 }
 0x3b0   : > { %v1091_v0 = vpop.xlane.xlu0 %1090 }
 0x3b1   : > { %v1127_v13 = vmul.f32 0.0078125, %v1091_v0  ;;  %1249 = vadd.xlane.f32.xlu1 %v1190_v42 }
 0x3b2   : > { %v1093_v21 = vpop.xlane.xlu1 %1092 }
 0x3b3   : > { %v2785_v29 = vsub.f32 %v2630_v52, %v1127_v13  ;;  %v1128_v7 = vmul.f32 0.0078125, %v1093_v21 }
 0x3b5   : > { %v2788_v35 = vsub.f32 %v2633_v12, %v1128_v7  ;;  %v1191_v33 = vmul.f32 %v2785_v29, %v2785_v29 }
 0x3b7   : > { %1251 = vadd.xlane.f32.xlu0 %v1191_v33  ;;  %v1192_v27 = vmul.f32 %v2788_v35, %v2788_v35 }
 0x3b8   : > { %v1095_v32 = vpop.xlane.xlu0 %1094 }
 0x3b9   : > { %v1129_v48 = vmul.f32 0.0078125, %v1095_v32  ;;  %1253 = vadd.xlane.f32.xlu1 %v1192_v27 }
 0x3ba   : > { %v1097_v1 = vpop.xlane.xlu1 %1096 }
 0x3bb   : > { %v2795_v53 = vsub.f32 %v2638_v10, %v1129_v48  ;;  %v1130_v52 = vmul.f32 0.0078125, %v1097_v1 }
 0x3bd   : > { %v2798_v23 = vsub.f32 %v2641_v18, %v1130_v52  ;;  %v1193_v12 = vmul.f32 %v2795_v53, %v2795_v53 }
 0x3bf   : > { %1255 = vadd.xlane.f32.xlu0 %v1193_v12  ;;  %v1194_v11 = vmul.f32 %v2798_v23, %v2798_v23 }
 0x3c1   : > { %1257 = vadd.xlane.f32.xlu1 %v1194_v11 }
 0x3d4   : > { %v1196_v57 = vpop.xlane.xlu0 %1195 }
 0x3d5   : > { %v1259_v8 = vmul.f32 0.0078125, %v1196_v57 }
 0x3d7   : > { %v1291_v54 = vadd.f32 1e-05, %v1259_v8 }
 0x3d8   : > { %v1198_v51 = vpop.xlane.xlu1 %1197 }
 0x3d9   : > { %1941 = vrsqrt.f32 %v1291_v54  ;;  %v1260_v10 = vmul.f32 0.0078125, %v1198_v51 }
 0x3db   : > { %v1292_v6 = vadd.f32 1e-05, %v1260_v10 }
 0x3dc   : > { %v1200_v9 = vpop.xlane.xlu0 %1199 }
 0x3dd   : > { %1943 = vrsqrt.f32 %v1292_v6  ;;  %v1261_v18 = vmul.f32 0.0078125, %v1200_v9 }
 0x3df   : > { %v1293_v46 = vadd.f32 1e-05, %v1261_v18 }
 0x3e0   : > { %v1202_v28 = vpop.xlane.xlu1 %1201 }
 0x3e1   : > { %1945 = vrsqrt.f32 %v1293_v46  ;;  %v1262_v25 = vmul.f32 0.0078125, %v1202_v28 }
 0x3e3   : > { %v1942_v15 = vpop.eup %1941  ;;  %v1294_v17 = vadd.f32 1e-05, %v1262_v25 }
 0x3e4   : > { %v1355_v42 = vmul.f32 %v1942_v15, %v2645_v38  ;;  %v1204_v0 = vpop.xlane.xlu0 %1203 }
 0x3e5   : > { %1947 = vrsqrt.f32 %v1294_v17  ;;  %v1263_v13 = vmul.f32 0.0078125, %v1204_v0 }
 0x3e6   : > { %v1391_v21 = vmul.f32 %v2807_v41, %v1355_v42  ;;  %v1206_v7 = vpop.xlane.xlu1 %1205 }
 0x3e7   : > { %v1944_v33 = vpop.eup %1943  ;;  %v1295_v27 = vadd.f32 1e-05, %v1263_v13  ;;  %v1264_v32 = vmul.f32 0.0078125, %v1206_v7 }
 0x3e8   : > { %v1427_v48 = vadd.f32 %v2809_v49, %v1391_v21  ;;  %v1356_v1 = vmul.f32 %v1944_v33, %v2650_v3 }
 0x3e9   : > { %1949 = vrsqrt.f32 %v1295_v27  ;;  %v1296_v52 = vadd.f32 1e-05, %v1264_v32 }
 0x3ea   : > { %1459 = vst [vmem:[#allocation7] sm:$0xff] %v1427_v48  ;;  %v1392_v12 = vmul.f32 %v2807_v41, %v1356_v1 }
 0x3eb   : > { %v1946_v11 = vpop.eup %1945  ;;  %1951 = vrsqrt.f32 %v1296_v52 }
 0x3ec   : > { %v1428_v38 = vadd.f32 %v2809_v49, %v1392_v12  ;;  %v1357_v57 = vmul.f32 %v1946_v11, %v2655_v39  ;;  %v1208_v8 = vpop.xlane.xlu0 %1207 }
 0x3ed   : > { %v1265_v54 = vmul.f32 0.0078125, %v1208_v8 }
 0x3ee   : > { %1460 = vst [vmem:[#allocation7 + $0x8] sm:$0xff] %v1428_v38  ;;  %v1393_v51 = vmul.f32 %v2807_v41, %v1357_v57  ;;  %v1210_v10 = vpop.xlane.xlu1 %1209 }
 0x3ef   : > { %v1948_v6 = vpop.eup %1947  ;;  %v1297_v9 = vadd.f32 1e-05, %v1265_v54  ;;  %v1266_v3 = vmul.f32 0.0078125, %v1210_v10 }
 0x3f0   : > { %v1429_v18 = vadd.f32 %v2809_v49, %v1393_v51  ;;  %v1358_v59 = vmul.f32 %v1948_v6, %v2660_v40 }
 0x3f1   : > { %1953 = vrsqrt.f32 %v1297_v9  ;;  %v1298_v63 = vadd.f32 1e-05, %v1266_v3 }
 0x3f2   : > { %1461 = vst [vmem:[#allocation7 + $0x10] sm:$0xff] %v1429_v18  ;;  %v1394_v46 = vmul.f32 %v2807_v41, %v1358_v59 }
 0x3f3   : > { %v1950_v19 = vpop.eup %1949  ;;  %1955 = vrsqrt.f32 %v1298_v63 }
 0x3f4   : > { %v1430_v39 = vadd.f32 %v2809_v49, %v1394_v46  ;;  %v1359_v28 = vmul.f32 %v1950_v19, %v2665_v5  ;;  %v1212_v25 = vpop.xlane.xlu0 %1211 }
 0x3f5   : > { %v1952_v61 = vpop.eup %1951  ;;  %v1267_v15 = vmul.f32 0.0078125, %v1212_v25 }
 0x3f6   : > { %1462 = vst [vmem:[#allocation7 + $0x18] sm:$0xff] %v1430_v39  ;;  %v1395_v17 = vmul.f32 %v2807_v41, %v1359_v28  ;;  %v1360_v42 = vmul.f32 %v1952_v61, %v2668_v31  ;;  %v1214_v40 = vpop.xlane.xlu1 %1213 }
 0x3f7   : > { %v1299_v0 = vadd.f32 1e-05, %v1267_v15  ;;  %v1268_v13 = vmul.f32 0.0078125, %v1214_v40 }
 0x3f8   : > { %v1431_v21 = vadd.f32 %v2809_v49, %v1395_v17  ;;  %v1396_v7 = vmul.f32 %v2807_v41, %v1360_v42 }
 0x3f9   : > { %1957 = vrsqrt.f32 %v1299_v0  ;;  %v1300_v33 = vadd.f32 1e-05, %v1268_v13 }
 0x3fa   : > { %1463 = vst [vmem:[#allocation7 + $0x20] sm:$0xff] %v1431_v21  ;;  %v1432_v5 = vadd.f32 %v2809_v49, %v1396_v7 }
 0x3fb   : > { %v1954_v27 = vpop.eup %1953  ;;  %1959 = vrsqrt.f32 %v1300_v33 }
 0x3fc   : > { %1464 = vst [vmem:[#allocation7 + $0x28] sm:$0xff] %v1432_v5  ;;  %v1361_v32 = vmul.f32 %v1954_v27, %v2675_v34  ;;  %v1216_v48 = vpop.xlane.xlu0 %1215 }
 0x3fd   : > { %v1956_v1 = vpop.eup %1955  ;;  %v1269_v31 = vmul.f32 0.0078125, %v1216_v48 }
 0x3fe   : > { %v1397_v52 = vmul.f32 %v2807_v41, %v1361_v32  ;;  %v1362_v12 = vmul.f32 %v1956_v1, %v2678_v36  ;;  %v1218_v11 = vpop.xlane.xlu1 %1217 }
 0x3ff   : > { %v1301_v38 = vadd.f32 1e-05, %v1269_v31  ;;  %v1270_v57 = vmul.f32 0.0078125, %v1218_v11 }
 0x400   : > { %v1433_v8 = vadd.f32 %v2809_v49, %v1397_v52  ;;  %v1398_v54 = vmul.f32 %v2807_v41, %v1362_v12 }
 0x401   : > { %1961 = vrsqrt.f32 %v1301_v38  ;;  %v1302_v51 = vadd.f32 1e-05, %v1270_v57 }
 0x402   : > { %1465 = vst [vmem:[#allocation7 + $0x30] sm:$0xff] %v1433_v8  ;;  %v1434_v10 = vadd.f32 %v2809_v49, %v1398_v54 }
 0x403   : > { %v1958_v34 = vpop.eup %1957  ;;  %1963 = vrsqrt.f32 %v1302_v51 }
 0x404   : > { %1466 = vst [vmem:[#allocation7 + $0x38] sm:$0xff] %v1434_v10  ;;  %v1363_v6 = vmul.f32 %v1958_v34, %v2685_v62  ;;  %v1220_v9 = vpop.xlane.xlu0 %1219 }
 0x405   : > { %v1960_v3 = vpop.eup %1959  ;;  %v1271_v36 = vmul.f32 0.0078125, %v1220_v9 }
 0x406   : > { %v1399_v18 = vmul.f32 %v2807_v41, %v1363_v6  ;;  %v1364_v59 = vmul.f32 %v1960_v3, %v2688_v50  ;;  %v1222_v63 = vpop.xlane.xlu1 %1221 }
 0x407   : > { %v1303_v46 = vadd.f32 1e-05, %v1271_v36  ;;  %v1272_v19 = vmul.f32 0.0078125, %v1222_v63 }
 0x408   : > { %v1435_v39 = vadd.f32 %v2809_v49, %v1399_v18  ;;  %v1400_v28 = vmul.f32 %v2807_v41, %v1364_v59 }
 0x409   : > { %1965 = vrsqrt.f32 %v1303_v46  ;;  %v1304_v25 = vadd.f32 1e-05, %v1272_v19 }
 0x40a   : > { %1467 = vst [vmem:[#allocation7 + $0x40] sm:$0xff] %v1435_v39  ;;  %v1436_v61 = vadd.f32 %v2809_v49, %v1400_v28 }
 0x40b   : > { %v1962_v62 = vpop.eup %1961  ;;  %1967 = vrsqrt.f32 %v1304_v25 }
 0x40c   : > { %1468 = vst [vmem:[#allocation7 + $0x48] sm:$0xff] %v1436_v61  ;;  %v1365_v15 = vmul.f32 %v1962_v62, %v2695_v4  ;;  %v1224_v17 = vpop.xlane.xlu0 %1223 }
 0x40d   : > { %v1964_v42 = vpop.eup %1963  ;;  %v1273_v50 = vmul.f32 0.0078125, %v1224_v17 }
 0x40e   : > { %v1401_v40 = vmul.f32 %v2807_v41, %v1365_v15  ;;  %v1366_v0 = vmul.f32 %v1964_v42, %v2698_v44  ;;  %v1226_v13 = vpop.xlane.xlu1 %1225 }
 0x40f   : > { %v1305_v21 = vadd.f32 1e-05, %v1273_v50  ;;  %v1274_v7 = vmul.f32 0.0078125, %v1226_v13 }
 0x410   : > { %v1437_v33 = vadd.f32 %v2809_v49, %v1401_v40  ;;  %v1402_v5 = vmul.f32 %v2807_v41, %v1366_v0 }
 0x411   : > { %1969 = vrsqrt.f32 %v1305_v21  ;;  %v1306_v27 = vadd.f32 1e-05, %v1274_v7 }
 0x412   : > { %1469 = vst [vmem:[#allocation7 + $0x50] sm:$0xff] %v1437_v33  ;;  %v1438_v32 = vadd.f32 %v2809_v49, %v1402_v5 }
 0x413   : > { %v1966_v4 = vpop.eup %1965  ;;  %1971 = vrsqrt.f32 %v1306_v27 }
 0x414   : > { %1470 = vst [vmem:[#allocation7 + $0x58] sm:$0xff] %v1438_v32  ;;  %v1367_v48 = vmul.f32 %v1966_v4, %v2705_v45  ;;  %v1228_v1 = vpop.xlane.xlu0 %1227 }
 0x415   : > { %v1968_v31 = vpop.eup %1967  ;;  %v1275_v44 = vmul.f32 0.0078125, %v1228_v1 }
 0x416   : > { %v1403_v52 = vmul.f32 %v2807_v41, %v1367_v48  ;;  %v1368_v12 = vmul.f32 %v1968_v31, %v2708_v24  ;;  %v1230_v11 = vpop.xlane.xlu1 %1229 }
 0x417   : > { %v1307_v38 = vadd.f32 1e-05, %v1275_v44  ;;  %v1276_v57 = vmul.f32 0.0078125, %v1230_v11 }
 0x418   : > { %v1439_v8 = vadd.f32 %v2809_v49, %v1403_v52  ;;  %v1404_v54 = vmul.f32 %v2807_v41, %v1368_v12 }
 0x419   : > { %1973 = vrsqrt.f32 %v1307_v38  ;;  %v1308_v51 = vadd.f32 1e-05, %v1276_v57 }
 0x41a   : > { %1471 = vst [vmem:[#allocation7 + $0x60] sm:$0xff] %v1439_v8  ;;  %v1440_v10 = vadd.f32 %v2809_v49, %v1404_v54 }
 0x41b   : > { %v1970_v45 = vpop.eup %1969  ;;  %1975 = vrsqrt.f32 %v1308_v51 }
 0x41c   : > { %1472 = vst [vmem:[#allocation7 + $0x68] sm:$0xff] %v1440_v10  ;;  %v1369_v34 = vmul.f32 %v1970_v45, %v2715_v37  ;;  %v1232_v6 = vpop.xlane.xlu0 %1231 }
 0x41d   : > { %v1972_v9 = vpop.eup %1971  ;;  %v1277_v24 = vmul.f32 0.0078125, %v1232_v6 }
 0x41e   : > { %v1405_v3 = vmul.f32 %v2807_v41, %v1369_v34  ;;  %v1370_v36 = vmul.f32 %v1972_v9, %v2718_v30  ;;  %v1234_v18 = vpop.xlane.xlu1 %1233 }
 0x41f   : > { %v1309_v59 = vadd.f32 1e-05, %v1277_v24  ;;  %v1278_v63 = vmul.f32 0.0078125, %v1234_v18 }
 0x420   : > { %v1441_v46 = vadd.f32 %v2809_v49, %v1405_v3  ;;  %v1406_v19 = vmul.f32 %v2807_v41, %v1370_v36 }
 0x421   : > { %1977 = vrsqrt.f32 %v1309_v59  ;;  %v1310_v39 = vadd.f32 1e-05, %v1278_v63 }
 0x422   : > { %1473 = vst [vmem:[#allocation7 + $0x70] sm:$0xff] %v1441_v46  ;;  %v1442_v28 = vadd.f32 %v2809_v49, %v1406_v19 }
 0x423   : > { %v1974_v37 = vpop.eup %1973  ;;  %1979 = vrsqrt.f32 %v1310_v39 }
 0x424   : > { %1474 = vst [vmem:[#allocation7 + $0x78] sm:$0xff] %v1442_v28  ;;  %v1371_v25 = vmul.f32 %v1974_v37, %v2725_v55  ;;  %v1236_v61 = vpop.xlane.xlu0 %1235 }
 0x425   : > { %v1976_v62 = vpop.eup %1975  ;;  %v1279_v30 = vmul.f32 0.0078125, %v1236_v61 }
 0x426   : > { %v1407_v15 = vmul.f32 %v2807_v41, %v1371_v25  ;;  %v1372_v17 = vmul.f32 %v1976_v62, %v2728_v14  ;;  %v1238_v42 = vpop.xlane.xlu1 %1237 }
 0x427   : > { %v1311_v50 = vadd.f32 1e-05, %v1279_v30  ;;  %v1280_v40 = vmul.f32 0.0078125, %v1238_v42 }
 0x428   : > { %v1443_v0 = vadd.f32 %v2809_v49, %v1407_v15  ;;  %v1408_v13 = vmul.f32 %v2807_v41, %v1372_v17 }
 0x429   : > { %1981 = vrsqrt.f32 %v1311_v50  ;;  %v1312_v21 = vadd.f32 1e-05, %v1280_v40 }
 0x42a   : > { %1475 = vst [vmem:[#allocation7 + $0x80] sm:$0xff] %v1443_v0  ;;  %v1444_v7 = vadd.f32 %v2809_v49, %v1408_v13 }
 0x42b   : > { %v1978_v55 = vpop.eup %1977  ;;  %1983 = vrsqrt.f32 %v1312_v21 }
 0x42c   : > { %1476 = vst [vmem:[#allocation7 + $0x88] sm:$0xff] %v1444_v7  ;;  %v1373_v33 = vmul.f32 %v1978_v55, %v2735_v56  ;;  %v1240_v5 = vpop.xlane.xlu0 %1239 }
 0x42d   : > { %v1980_v27 = vpop.eup %1979  ;;  %v1281_v14 = vmul.f32 0.0078125, %v1240_v5 }
 0x42e   : > { %v1409_v32 = vmul.f32 %v2807_v41, %v1373_v33  ;;  %v1374_v4 = vmul.f32 %v1980_v27, %v2738_v47  ;;  %v1242_v48 = vpop.xlane.xlu1 %1241 }
 0x42f   : > { %v1313_v1 = vadd.f32 1e-05, %v1281_v14  ;;  %v1282_v31 = vmul.f32 0.0078125, %v1242_v48 }
 0x430   : > { %v1445_v44 = vadd.f32 %v2809_v49, %v1409_v32  ;;  %v1410_v52 = vmul.f32 %v2807_v41, %v1374_v4 }
 0x431   : > { %1985 = vrsqrt.f32 %v1313_v1  ;;  %v1314_v12 = vadd.f32 1e-05, %v1282_v31 }
 0x432   : > { %1477 = vst [vmem:[#allocation7 + $0x90] sm:$0xff] %v1445_v44  ;;  %v1446_v11 = vadd.f32 %v2809_v49, %v1410_v52 }
 0x433   : > { %v1982_v56 = vpop.eup %1981  ;;  %1987 = vrsqrt.f32 %v1314_v12 }
 0x434   : > { %1478 = vst [vmem:[#allocation7 + $0x98] sm:$0xff] %v1446_v11  ;;  %v1375_v38 = vmul.f32 %v1982_v56, %v2745_v58  ;;  %v1244_v57 = vpop.xlane.xlu0 %1243 }
 0x435   : > { %v1984_v8 = vpop.eup %1983  ;;  %v1283_v47 = vmul.f32 0.0078125, %v1244_v57 }
 0x436   : > { %v1411_v54 = vmul.f32 %v2807_v41, %v1375_v38  ;;  %v1376_v51 = vmul.f32 %v1984_v8, %v2748_v22  ;;  %v1246_v10 = vpop.xlane.xlu1 %1245 }
 0x437   : > { %v1315_v45 = vadd.f32 1e-05, %v1283_v47  ;;  %v1284_v34 = vmul.f32 0.0078125, %v1246_v10 }
 0x438   : > { %v1447_v6 = vadd.f32 %v2809_v49, %v1411_v54  ;;  %v1412_v9 = vmul.f32 %v2807_v41, %v1376_v51 }
 0x439   : > { %1989 = vrsqrt.f32 %v1315_v45  ;;  %v1316_v24 = vadd.f32 1e-05, %v1284_v34 }
 0x43a   : > { %1479 = vst [vmem:[#allocation7 + $0xa0] sm:$0xff] %v1447_v6  ;;  %v1448_v3 = vadd.f32 %v2809_v49, %v1412_v9 }
 0x43b   : > { %v1986_v58 = vpop.eup %1985  ;;  %1991 = vrsqrt.f32 %v1316_v24 }
 0x43c   : > { %1480 = vst [vmem:[#allocation7 + $0xa8] sm:$0xff] %v1448_v3  ;;  %v1377_v36 = vmul.f32 %v1986_v58, %v2755_v26  ;;  %v1248_v18 = vpop.xlane.xlu0 %1247 }
 0x43d   : > { %v1988_v59 = vpop.eup %1987  ;;  %v1285_v22 = vmul.f32 0.0078125, %v1248_v18 }
 0x43e   : > { %v1413_v63 = vmul.f32 %v2807_v41, %v1377_v36  ;;  %v1378_v46 = vmul.f32 %v1988_v59, %v2758_v16  ;;  %v1250_v19 = vpop.xlane.xlu1 %1249 }
 0x43f   : > { %v1317_v39 = vadd.f32 1e-05, %v1285_v22  ;;  %v1286_v28 = vmul.f32 0.0078125, %v1250_v19 }
 0x440   : > { %v1449_v37 = vadd.f32 %v2809_v49, %v1413_v63  ;;  %v1414_v25 = vmul.f32 %v2807_v41, %v1378_v46 }
 0x441   : > { %1993 = vrsqrt.f32 %v1317_v39  ;;  %v1318_v61 = vadd.f32 1e-05, %v1286_v28 }
 0x442   : > { %1481 = vst [vmem:[#allocation7 + $0xb0] sm:$0xff] %v1449_v37  ;;  %v1450_v62 = vadd.f32 %v2809_v49, %v1414_v25 }
 0x443   : > { %v1990_v26 = vpop.eup %1989  ;;  %1995 = vrsqrt.f32 %v1318_v61 }
 0x444   : > { %1482 = vst [vmem:[#allocation7 + $0xb8] sm:$0xff] %v1450_v62  ;;  %v1379_v30 = vmul.f32 %v1990_v26, %v2765_v20  ;;  %v1252_v15 = vpop.xlane.xlu0 %1251 }
 0x445   : > { %v1992_v17 = vpop.eup %1991  ;;  %v1287_v16 = vmul.f32 0.0078125, %v1252_v15 }
 0x446   : > { %v1415_v42 = vmul.f32 %v2807_v41, %v1379_v30  ;;  %v1380_v50 = vmul.f32 %v1992_v17, %v2768_v60  ;;  %v1254_v40 = vpop.xlane.xlu1 %1253 }
 0x447   : > { %v1319_v0 = vadd.f32 1e-05, %v1287_v16  ;;  %v1288_v13 = vmul.f32 0.0078125, %v1254_v40 }
 0x448   : > { %v1451_v21 = vadd.f32 %v2809_v49, %v1415_v42  ;;  %v1416_v7 = vmul.f32 %v2807_v41, %v1380_v50 }
 0x449   : > { %1997 = vrsqrt.f32 %v1319_v0  ;;  %v1320_v55 = vadd.f32 1e-05, %v1288_v13 }
 0x44a   : > { %1483 = vst [vmem:[#allocation7 + $0xc0] sm:$0xff] %v1451_v21  ;;  %v1452_v33 = vadd.f32 %v2809_v49, %v1416_v7 }
 0x44b   : > { %v1994_v20 = vpop.eup %1993  ;;  %1999 = vrsqrt.f32 %v1320_v55 }
 0x44c   : > { %1484 = vst [vmem:[#allocation7 + $0xc8] sm:$0xff] %v1452_v33  ;;  %v1381_v5 = vmul.f32 %v1994_v20, %v2775_v2  ;;  %v1256_v27 = vpop.xlane.xlu0 %1255 }
 0x44d   : > { %v1996_v14 = vpop.eup %1995  ;;  %v1289_v60 = vmul.f32 0.0078125, %v1256_v27 }
 0x44e   : > { %v1417_v32 = vmul.f32 %v2807_v41, %v1381_v5  ;;  %v1382_v4 = vmul.f32 %v1996_v14, %v2778_v43  ;;  %v1258_v48 = vpop.xlane.xlu1 %1257 }
 0x44f   : > { %v1321_v1 = vadd.f32 1e-05, %v1289_v60  ;;  %v1290_v31 = vmul.f32 0.0078125, %v1258_v48 }
 0x450   : > { %v1453_v44 = vadd.f32 %v2809_v49, %v1417_v32  ;;  %v1418_v52 = vmul.f32 %v2807_v41, %v1382_v4 }
 0x451   : > { %2001 = vrsqrt.f32 %v1321_v1  ;;  %v1322_v12 = vadd.f32 1e-05, %v1290_v31 }
 0x452   : > { %1485 = vst [vmem:[#allocation7 + $0xd0] sm:$0xff] %v1453_v44  ;;  %v1454_v11 = vadd.f32 %v2809_v49, %v1418_v52 }
 0x453   : > { %v1998_v2 = vpop.eup %1997  ;;  %2003 = vrsqrt.f32 %v1322_v12 }
 0x454   : > { %1486 = vst [vmem:[#allocation7 + $0xd8] sm:$0xff] %v1454_v11  ;;  %v1383_v56 = vmul.f32 %v1998_v2, %v2785_v29 }
 0x455   : > { %v2000_v38 = vpop.eup %1999 }
 0x456   : > { %v1419_v43 = vmul.f32 %v2807_v41, %v1383_v56  ;;  %v1384_v57 = vmul.f32 %v2000_v38, %v2788_v35 }
 0x458   : > { %v1455_v8 = vadd.f32 %v2809_v49, %v1419_v43  ;;  %v1420_v47 = vmul.f32 %v2807_v41, %v1384_v57 }
 0x45a   : > { %1487 = vst [vmem:[#allocation7 + $0xe0] sm:$0xff] %v1455_v8  ;;  %v1456_v54 = vadd.f32 %v2809_v49, %v1420_v47 }
 0x45b   : > { %v2002_v51 = vpop.eup %2001 }
 0x45c   : > { %1488 = vst [vmem:[#allocation7 + $0xe8] sm:$0xff] %v1456_v54  ;;  %v1385_v29 = vmul.f32 %v2002_v51, %v2795_v53 }
 0x45d   : > { %v2004_v10 = vpop.eup %2003 }
 0x45e   : > { %v1421_v45 = vmul.f32 %v2807_v41, %v1385_v29  ;;  %v1386_v35 = vmul.f32 %v2004_v10, %v2798_v23 }
 0x460   : > { %v1457_v34 = vadd.f32 %v2809_v49, %v1421_v45  ;;  %v1422_v6 = vmul.f32 %v2807_v41, %v1386_v35 }
 0x462   : > { %1489 = vst [vmem:[#allocation7 + $0xf0] sm:$0xff] %v1457_v34  ;;  %v1458_v9 = vadd.f32 %v2809_v49, %v1422_v6 }
 0x464   : > { %1490 = vst [vmem:[#allocation7 + $0xf8] sm:$0xff] %v1458_v9 }
 0x465   : > { %2086 = shalt.err (!%p2083_p12)
}
 0x466   : > { %s2087_s21 = scalar_lea.hbm %s2943_s4, 4096 }
 0x467   : > { %p2088_p13 = scmp.ne.s32.totalorder %s2943_s4, %s2087_s21  ;;  %p2093_p9 = scmp.lt.u32.totalorder %s2087_s21, %s2943_s4 }
 0x469   : > { %p2089_p0 = pnand %p2088_p13, %p1764_p5 }
 0x46b   : > { %p2090_p4 = pneg %p2089_p0 }
 0x46d   : > { %p2095_p6 = pnand %p2093_p9, %p2090_p4 }
 0x46f   : > { %2098 = shalt.err (!%p2095_p6)
}
 0x470   : > { %s2136_s27 = smov 128   ;;  %s2137_s28 = smov 8  }
 0x471   : > { %1754 = dma.vmem_to_hbm [thread:$0]  (%p1764_p5), %s2233_s25, 4096, %s2943_s4, [#allocation6], %s2136_s27, %s2136_s27, %s2137_s28  }
 0x472   : > { %2116 = dma.done.wait (%p1764_p5), [#allocation6], 4096  }
 0x473   : > { %2118 = vsyncadd (%p1764_p5), [#allocation6], 4294963200 }
 0x474 PF: > { %s16_s15 = sadd.s32 1, %s2121_s15  }
 0x475   : > { %p13_p1 = scmp.ge.s32.totalorder %s16_s15, 4  }
 0x477   :  { %15 = sbr.rel (!%p13_p1) target bundleno = 2 (0x2), region = 77 }
 0x47e   :  { %1513 = vsyncpa [#allocation5], 1 }
 0x47f   :  { %1515 = vsyncpa [#allocation5 + $0x1], 1 }
 0x480   :  { %1516 = vsyncpa [#allocation6], 1 }
 0x481   :  { %1518 = vsyncpa [#allocation6 + $0x1], 1 }
 0x482   :  { %1519 = vsyncmov [#allocation3] }
 0x485   :  { %s1520_s5 = vpop.sfrf %1519 }
 0x486   :  { %p1619_p8 = scmp.ne.s32.totalorder %s1520_s5, 0 }
 0x488   :  { %1524 = shalt.err (%p1619_p8)  }
 0x489   :  { %1526 = vsyncmov [#allocation3 + $0x1] }
 0x48c   :  { %s1527_s25 = vpop.sfrf %1526 }
 0x48d   :  { %p1620_p7 = scmp.ne.s32.totalorder %s1527_s25, 0 }
 0x48f   :  { %1531 = shalt.err (%p1620_p7)  }

</bundles_post_ra>
